<compile_context>
chip_gen: v6e
topology: v6e:2x2x1
jax: 0.10.0
libtpu: 0.0.40
codegen_flags: <defaults>
</compile_context>

<pallas_src>
import math

import jax
import jax.numpy as jnp
from jax import lax
from jax.experimental import pallas as pl
from jax.experimental.pallas import tpu as pltpu


_NEG_INF = -1e30
_INV_SQRT2 = 1.0 / math.sqrt(2.0)
_GELU_C = math.sqrt(2.0 / math.pi)


def _vmem_limit_bytes():
    """Chip-adaptive scoped-VMEM budget.

    v7x has only 64 MiB VMEM per TensorCore -> leave headroom for
    double-buffered row tiles + compiler scratch; v5e/v6e have 128 MiB ->
    allow large row tiles.  Falls back to a conservative 48 MiB.
    """
    try:
        cap = getattr(pltpu.get_tpu_info(), "vmem_capacity_bytes", None)
        if cap:
            return int(max(min(cap - 16 * 1024 * 1024, 112 * 1024 * 1024),
                           32 * 1024 * 1024))
    except Exception:
        pass
    return 48 * 1024 * 1024


# Minor-dim-preserving (m, h, d) -> (h, m, d) swap.  Prefer the lane-layout
# aware pltpu.einshape; fall back to jnp.transpose if unavailable.
if hasattr(pltpu, "einshape"):
    def _swap01(x):
        return pltpu.einshape("mhd->hmd", x)
else:
    def _swap01(x):
        return jnp.transpose(x, (1, 0, 2))


def _layernorm(h, gamma, beta, eps=1e-5):
    mu = jnp.mean(h, axis=-1, keepdims=True)
    var = jnp.mean((h - mu) ** 2, axis=-1, keepdims=True)
    return (h - mu) * lax.rsqrt(var + eps) * gamma + beta


# --------------------------------------------------------------------------
# Kernel 1: ln1 + fused QKV projection, head-split outputs.
# One (1, tr, C) row tile per step -> three (1, nh, tr, hs) bf16 outputs.
# --------------------------------------------------------------------------
def _qkv_kernel(x_ref, g1_ref, b1_ref, w_attn_ref, q_ref, k_ref, v_ref):
    _, nh, tr, hs = q_ref.shape
    C = nh * hs

    x = x_ref[0]                                          # (tr, C) f32
    h = _layernorm(x, g1_ref[...], b1_ref[...])
    qkv = jnp.dot(h.astype(jnp.bfloat16), w_attn_ref[...],
                  preferred_element_type=jnp.float32)     # (tr, 3C) f32 accum
    qkv = qkv.astype(jnp.bfloat16)

    def to_heads(t):                                      # (tr, C) -> (nh, tr, hs)
        return _swap01(t.reshape(tr, nh, hs))

    # 1/sqrt(hs) softmax scale is already folded into W_q in the wrapper.
    q_ref[0] = to_heads(qkv[:, :C])
    k_ref[0] = to_heads(qkv[:, C:2 * C])
    v_ref[0] = to_heads(qkv[:, 2 * C:])


# --------------------------------------------------------------------------
# Kernel 2: flash-style causal attention, all heads batched via einsum.
# grid = (B, num_q_tiles, num_kv_tiles); kv axis is the (last) reduction axis.
# Output is written lane-dense as (1, tq, C).
# --------------------------------------------------------------------------
def _attn_kernel(q_ref, k_ref, v_ref, o_ref, m_sc, l_sc, acc_sc):
    qi = pl.program_id(1)
    ki = pl.program_id(2)
    nk = pl.num_programs(2)

    @pl.when(ki == 0)
    def _init():
        m_sc[...] = jnp.full_like(m_sc, -jnp.inf)
        l_sc[...] = jnp.zeros_like(l_sc)
        acc_sc[...] = jnp.zeros_like(acc_sc)

    def _update(masked):
        q = q_ref[0]                                      # (nh, tq, hs) bf16
        k = k_ref[0]                                      # (nh, tkv, hs) bf16
        v = v_ref[0]                                      # (nh, tkv, hs) bf16

        s = jnp.einsum('hqd,hkd->hqk', q, k,
                       preferred_element_type=jnp.float32)  # (nh, tq, tkv) f32
        if masked:
            # Diagonal block only (qi == ki, tq == tkv): 2-D mask broadcast
            # over heads -- no per-head iota/compare VALU work.
            tq, tkv = s.shape[1], s.shape[2]
            rows = lax.broadcasted_iota(jnp.int32, (tq, tkv), 0)
            cols = lax.broadcasted_iota(jnp.int32, (tq, tkv), 1)
            s = jnp.where((cols <= rows)[None, :, :], s, _NEG_INF)

        m_prev = m_sc[...]
        m_new = jnp.maximum(m_prev, jnp.max(s, axis=-1, keepdims=True))
        alpha = jnp.exp(m_prev - m_new)
        p = jnp.exp(s - m_new)
        l_sc[...] = alpha * l_sc[...] + jnp.sum(p, axis=-1, keepdims=True)
        acc_sc[...] = alpha * acc_sc[...] + jnp.einsum(
            'hqk,hkd->hqd', p.astype(v.dtype), v,
            preferred_element_type=jnp.float32)
        m_sc[...] = m_new

    # Strictly-below-diagonal blocks are fully unmasked: no mask work at all.
    @pl.when(ki < qi)
    def _full_block():
        _update(masked=False)

    # Only the diagonal block needs the causal mask.
    @pl.when(ki == qi)
    def _diag_block():
        _update(masked=True)

    # Blocks with ki > qi are fully masked: compute skipped entirely, and the
    # K/V index_maps clamp their block index so no DMA is issued either.

    @pl.when(ki == nk - 1)
    def _finalize():
        nh, tq, hs = acc_sc.shape
        inv_l = pl.reciprocal(l_sc[...], approx=True)     # EUP, frees VALU slots
        o = acc_sc[...] * inv_l                           # (nh, tq, hs) f32
        o = _swap01(o).reshape(tq, nh * hs)               # lane-dense (tq, C)
        o_ref[0] = o.astype(o_ref.dtype)


# --------------------------------------------------------------------------
# Kernel 3: attention out-proj + residual + ln2 + MLP (GELU) + residual.
# One (1, tr, C) row tile per step; output is lane-dense f32.
# --------------------------------------------------------------------------
def _out_kernel(x_ref, y_ref, wproj_ref, bproj_ref, g2_ref, b2_ref,
                wfc_ref, bfc_ref, wmp_ref, bmp_ref, o_ref):
    x = x_ref[0]                                          # (tr, C) f32
    y = y_ref[0]                                          # (tr, C) bf16

    attn = jnp.dot(y, wproj_ref[...],
                   preferred_element_type=jnp.float32) + bproj_ref[...]
    x1 = x + attn                                         # residual 1 (f32)

    h2 = _layernorm(x1, g2_ref[...], b2_ref[...])
    a = jnp.dot(h2.astype(jnp.bfloat16), wfc_ref[...],
                preferred_element_type=jnp.float32) + bfc_ref[...]   # (tr, 4C)
    # GELU (tanh form): tanh is a native EUP op (separate slot) whereas erf
    # expands into VALU work; numeric delta vs exact GELU is < 1e-3.
    # TODO(synk): switch back to exact erf-GELU if lax.erf lowering is needed
    #             for bit-closer parity with nn.GELU().
    g = 0.5 * a * (1.0 + jnp.tanh(_GELU_C * (a + 0.044715 * (a * a * a))))
    mlp = jnp.dot(g.astype(jnp.bfloat16), wmp_ref[...],
                  preferred_element_type=jnp.float32) + bmp_ref[...]

    o_ref[0] = (x1 + mlp).astype(o_ref.dtype)             # residual 2


# --------------------------------------------------------------------------
# Wrapper
# --------------------------------------------------------------------------
def _pick_tile(T, cap):
    t = min(T, cap)
    while t > 1 and T % t:
        t //= 2
    return t


def transformer_block(x, params, n_head, *, tq=None, row_tile=None):
    """x: (B, T, C) float32. params: dict of pre-transposed (in, out) weights."""
    B, T, C = x.shape
    assert C % n_head == 0
    nh = n_head
    hs = C // nh

    # Attention seq tile (tq == tkv required for the diagonal-mask shortcut)
    # and row tile for the projection/MLP kernels (bigger is better on the
    # 128 MiB-VMEM chips; per-step overhead amortizes at >=256 rows).
    if tq is None:
        tq = _pick_tile(T, 256)
    if row_tile is None:
        row_tile = _pick_tile(T, 512)
    tkv = tq
    assert T % tq == 0, "T must be a multiple of the attention seq tile"
    assert T % row_tile == 0, "T must be a multiple of the row tile"
    nq = T // tq
    nk = T // tkv
    nr = T // row_tile

    f32, bf16 = jnp.float32, jnp.bfloat16
    vmem_limit = _vmem_limit_bytes()

    # Fold the 1/sqrt(hs) softmax scale into W_q (f32 multiply, then bf16 cast):
    # removes a per-element multiply over the full (nh, tq, tkv) score tensor.
    scale = 1.0 / math.sqrt(hs)
    w_attn_f32 = params["w_attn"]
    w_attn = jnp.concatenate(
        [w_attn_f32[:, :C] * scale, w_attn_f32[:, C:]], axis=1).astype(bf16)
    w_attn_proj = params["w_attn_proj"].astype(bf16)
    w_fc = params["w_fc"].astype(bf16)
    w_mlp_proj = params["w_mlp_proj"].astype(bf16)

    def const_spec(shape):
        # Grid-invariant operand (weights / biases): constant block index, so
        # Pallas DMAs it only once across the grid.  (For very large C on v7x
        # one would additionally single-buffer these, e.g. via
        # pipeline_mode=pl.Buffered(1), to halve the weight VMEM footprint.)
        return pl.BlockSpec(shape, lambda b, i: (0,) * len(shape))

    row_params = pltpu.CompilerParams(
        dimension_semantics=("parallel", "parallel"),
        vmem_limit_bytes=vmem_limit)

    # ---- 1) ln1 + fused QKV projection, head-split outputs -----------------
    q, k, v = pl.pallas_call(
        _qkv_kernel,
        out_shape=(jax.ShapeDtypeStruct((B, nh, T, hs), bf16),
                   jax.ShapeDtypeStruct((B, nh, T, hs), bf16),
                   jax.ShapeDtypeStruct((B, nh, T, hs), bf16)),
        grid=(B, nr),
        in_specs=[
            pl.BlockSpec((1, row_tile, C), lambda b, i: (b, i, 0)),
            const_spec((1, C)),
            const_spec((1, C)),
            const_spec((C, 3 * C)),
        ],
        out_specs=(
            pl.BlockSpec((1, nh, row_tile, hs), lambda b, i: (b, 0, i, 0)),
            pl.BlockSpec((1, nh, row_tile, hs), lambda b, i: (b, 0, i, 0)),
            pl.BlockSpec((1, nh, row_tile, hs), lambda b, i: (b, 0, i, 0)),
        ),
        compiler_params=row_params,
    )(x, params["ln1_g"], params["ln1_b"], w_attn)

    # ---- 2) flash-style causal attention, lane-dense (B, T, C) output ------
    # K/V index_maps clamp the kv block index to the q tile: blocks above the
    # diagonal reuse the already-resident buffer (no DMA), and pl.when skips
    # their compute.
    y = pl.pallas_call(
        _attn_kernel,
        out_shape=jax.ShapeDtypeStruct((B, T, C), bf16),
        grid=(B, nq, nk),
        in_specs=[
            pl.BlockSpec((1, nh, tq, hs), lambda b, i, j: (b, 0, i, 0)),
            pl.BlockSpec((1, nh, tkv, hs),
                         lambda b, i, j: (b, 0, jnp.minimum(j, i), 0)),
            pl.BlockSpec((1, nh, tkv, hs),
                         lambda b, i, j: (b, 0, jnp.minimum(j, i), 0)),
        ],
        out_specs=pl.BlockSpec((1, tq, C), lambda b, i, j: (b, i, 0)),
        scratch_shapes=[
            pltpu.VMEM((nh, tq, 1), f32),     # running max
            pltpu.VMEM((nh, tq, 1), f32),     # running denom
            pltpu.VMEM((nh, tq, hs), f32),    # output accumulator
        ],
        compiler_params=pltpu.CompilerParams(
            dimension_semantics=("parallel", "parallel", "arbitrary"),
            vmem_limit_bytes=vmem_limit),
    )(q, k, v)

    # ---- 3) out-proj + residual + ln2 + MLP + residual ---------------------
    out = pl.pallas_call(
        _out_kernel,
        out_shape=jax.ShapeDtypeStruct((B, T, C), f32),
        grid=(B, nr),
        in_specs=[
            pl.BlockSpec((1, row_tile, C), lambda b, i: (b, i, 0)),   # x (residual)
            pl.BlockSpec((1, row_tile, C), lambda b, i: (b, i, 0)),   # attention y
            const_spec((C, C)),
            const_spec((1, C)),
            const_spec((1, C)),
            const_spec((1, C)),
            const_spec((C, 4 * C)),
            const_spec((1, 4 * C)),
            const_spec((4 * C, C)),
            const_spec((1, C)),
        ],
        out_specs=pl.BlockSpec((1, row_tile, C), lambda b, i: (b, i, 0)),
        compiler_params=row_params,
    )(x, y,
      w_attn_proj, params["b_attn_proj"],
      params["ln2_g"], params["ln2_b"],
      w_fc, params["b_fc"],
      w_mlp_proj, params["b_mlp_proj"])

    return out


# --------------------------------------------------------------------------
# Parameters / reference
# --------------------------------------------------------------------------
def make_params(key, n_embd):
    C = n_embd
    ks = jax.random.split(key, 8)
    std = 0.02
    return {
        "ln1_g": jnp.ones((1, C), jnp.float32),
        "ln1_b": jnp.zeros((1, C), jnp.float32),
        "w_attn": std * jax.random.normal(ks[0], (C, 3 * C), jnp.float32),
        "w_attn_proj": std * jax.random.normal(ks[1], (C, C), jnp.float32),
        "b_attn_proj": std * jax.random.normal(ks[2], (1, C), jnp.float32),
        "ln2_g": jnp.ones((1, C), jnp.float32),
        "ln2_b": jnp.zeros((1, C), jnp.float32),
        "w_fc": std * jax.random.normal(ks[3], (C, 4 * C), jnp.float32),
        "b_fc": std * jax.random.normal(ks[4], (1, 4 * C), jnp.float32),
        "w_mlp_proj": std * jax.random.normal(ks[5], (4 * C, C), jnp.float32),
        "b_mlp_proj": std * jax.random.normal(ks[6], (1, C), jnp.float32),
    }


def _reference_block(x, params, n_head):
    """Pure-JAX f32 reference matching the PyTorch Block forward (eval mode)."""
    B, T, C = x.shape
    hs = C // n_head

    def ln(h, g, b, eps=1e-5):
        mu = h.mean(-1, keepdims=True)
        var = ((h - mu) ** 2).mean(-1, keepdims=True)
        return (h - mu) / jnp.sqrt(var + eps) * g + b

    h = ln(x, params["ln1_g"][0], params["ln1_b"][0])
    qkv = h @ params["w_attn"]
    q, k, v = jnp.split(qkv, 3, axis=-1)
    heads = lambda t: t.reshape(B, T, n_head, hs).transpose(0, 2, 1, 3)
    q, k, v = heads(q), heads(k), heads(v)
    s = (q @ k.transpose(0, 1, 3, 2)) / math.sqrt(hs)
    mask = jnp.tril(jnp.ones((T, T), bool))
    s = jnp.where(mask, s, -jnp.inf)
    p = jax.nn.softmax(s, axis=-1)
    y = (p @ v).transpose(0, 2, 1, 3).reshape(B, T, C)
    attn = y @ params["w_attn_proj"] + params["b_attn_proj"][0]
    x1 = x + attn
    h2 = ln(x1, params["ln2_g"][0], params["ln2_b"][0])
    a = h2 @ params["w_fc"] + params["b_fc"][0]
    g = 0.5 * a * (1.0 + lax.erf(a * _INV_SQRT2))   # exact GELU (nn.GELU())
    mlp = g @ params["w_mlp_proj"] + params["b_mlp_proj"][0]
    return x1 + mlp


if __name__ == "__main__":
    # Small but tiling-exercising shapes: 2 q-tiles x 2 kv-tiles per batch.
    B, T, C, n_head = 2, 128, 128, 4
    key = jax.random.PRNGKey(0)
    kx, kp = jax.random.split(key)
    x = jax.random.normal(kx, (B, T, C), jnp.float32)
    params = make_params(kp, C)

    out = transformer_block(x, params, n_head, tq=64, row_tile=64)
    out = jax.block_until_ready(out)
    assert out.shape == (B, T, C)
    assert bool(jnp.all(jnp.isfinite(out)))

    ref = _reference_block(x, params, n_head)
    max_err = float(jnp.max(jnp.abs(out - ref)))
    assert max_err < 5e-2, f"max abs error {max_err}"
    print("KERNEL_OK")
</pallas_src>

<mosaic_0001>
module attributes {stable_mosaic.version = 11 : i64} {
  func.func @_qkv_kernel(%arg0: i32, %arg1: i32, %arg2: memref<1x64x128xf32, #tpu.memory_space<vmem>>, %arg3: memref<1x128xf32, #tpu.memory_space<vmem>>, %arg4: memref<1x128xf32, #tpu.memory_space<vmem>>, %arg5: memref<128x384xbf16, #tpu.memory_space<vmem>>, %arg6: memref<1x4x64x32xbf16, #tpu.memory_space<vmem>>, %arg7: memref<1x4x64x32xbf16, #tpu.memory_space<vmem>>, %arg8: memref<1x4x64x32xbf16, #tpu.memory_space<vmem>>) attributes {dimension_semantics = [#tpu.dimension_semantics<parallel>, #tpu.dimension_semantics<parallel>], iteration_bounds = array<i64: 2, 2>, scalar_prefetch = 0 : i64, scratch_operands = 0 : i64, tpu.core_type = #tpu.core_type<tc>, window_params = [{transform_indices = @transform_0, window_bounds = array<i64: 1, 64, 128>}, {pipeline_mode = #tpu.pipeline_mode<synchronous>, transform_indices = @transform_1, window_bounds = array<i64: 1, 128>}, {pipeline_mode = #tpu.pipeline_mode<synchronous>, transform_indices = @transform_2, window_bounds = array<i64: 1, 128>}, {pipeline_mode = #tpu.pipeline_mode<synchronous>, transform_indices = @transform_3, window_bounds = array<i64: 128, 384>}, {transform_indices = @transform_4, window_bounds = array<i64: 1, 4, 64, 32>}, {transform_indices = @transform_5, window_bounds = array<i64: 1, 4, 64, 32>}, {transform_indices = @transform_6, window_bounds = array<i64: 1, 4, 64, 32>}]} {
    %c0 = arith.constant 0 : index
    %c0_0 = arith.constant 0 : index
    %c0_1 = arith.constant 0 : index
    %0 = vector.load %arg2[%c0, %c0_0, %c0_1] : memref<1x64x128xf32, #tpu.memory_space<vmem>>, vector<1x64x128xf32>
    %1 = vector.shape_cast %0 : vector<1x64x128xf32> to vector<64x128xf32>
    %c0_2 = arith.constant 0 : index
    %c0_3 = arith.constant 0 : index
    %2 = vector.load %arg3[%c0_2, %c0_3] : memref<1x128xf32, #tpu.memory_space<vmem>>, vector<1x128xf32>
    %c0_4 = arith.constant 0 : index
    %c0_5 = arith.constant 0 : index
    %3 = vector.load %arg4[%c0_4, %c0_5] : memref<1x128xf32, #tpu.memory_space<vmem>>, vector<1x128xf32>
    %cst = arith.constant dense<0.000000e+00> : vector<64xf32>
    %4 = vector.multi_reduction <add>, %1, %cst [1] : vector<64x128xf32> to vector<64xf32>
    %5 = vector.shape_cast %4 : vector<64xf32> to vector<64x1xf32>
    %cst_6 = arith.constant 1.280000e+02 : f32
    %6 = vector.broadcast %cst_6 : f32 to vector<64x1xf32>
    %7 = arith.divf %5, %6 : vector<64x1xf32>
    %8 = vector.broadcast %7 : vector<64x1xf32> to vector<64x128xf32>
    %9 = arith.subf %1, %8 : vector<64x128xf32>
    %10 = arith.mulf %9, %9 : vector<64x128xf32>
    %cst_7 = arith.constant dense<0.000000e+00> : vector<64xf32>
    %11 = vector.multi_reduction <add>, %10, %cst_7 [1] : vector<64x128xf32> to vector<64xf32>
    %12 = vector.shape_cast %11 : vector<64xf32> to vector<64x1xf32>
    %cst_8 = arith.constant 1.280000e+02 : f32
    %13 = vector.broadcast %cst_8 : f32 to vector<64x1xf32>
    %14 = arith.divf %12, %13 : vector<64x1xf32>
    %15 = vector.broadcast %7 : vector<64x1xf32> to vector<64x128xf32>
    %16 = arith.subf %1, %15 : vector<64x128xf32>
    %cst_9 = arith.constant 9.99999974E-6 : f32
    %17 = vector.broadcast %cst_9 : f32 to vector<64x1xf32>
    %18 = arith.addf %14, %17 : vector<64x1xf32>
    %19 = math.rsqrt %18 : vector<64x1xf32>
    %20 = vector.broadcast %19 : vector<64x1xf32> to vector<64x128xf32>
    %21 = arith.mulf %16, %20 : vector<64x128xf32>
    %22 = vector.broadcast %2 : vector<1x128xf32> to vector<64x128xf32>
    %23 = arith.mulf %21, %22 : vector<64x128xf32>
    %24 = vector.broadcast %3 : vector<1x128xf32> to vector<64x128xf32>
    %25 = arith.addf %23, %24 : vector<64x128xf32>
    %26 = arith.truncf %25 : vector<64x128xf32> to vector<64x128xbf16>
    %c0_10 = arith.constant 0 : index
    %c0_11 = arith.constant 0 : index
    %27 = vector.load %arg5[%c0_10, %c0_11] : memref<128x384xbf16, #tpu.memory_space<vmem>>, vector<128x384xbf16>
    %cst_12 = arith.constant dense<0.000000e+00> : vector<64x384xf32>
    %28 = tpu.matmul %26, %27, %cst_12 {dimension_numbers = #tpu.dot_dimension_numbers<[1], [0], [0], [1], [0, 0, 1, 1], [], []>} : vector<64x128xbf16>, vector<128x384xbf16>, vector<64x384xf32> -> vector<64x384xf32>
    %29 = arith.truncf %28 : vector<64x384xf32> to vector<64x384xbf16>
    %30 = vector.extract_strided_slice %29 {offsets = [0, 0], sizes = [64, 128], strides = [1, 1]} : vector<64x384xbf16> to vector<64x128xbf16>
    %31 = vector.shape_cast %30 : vector<64x128xbf16> to vector<64x4x32xbf16>
    %32 = tpu.transpose %31, [1, 0, 2] : vector<64x4x32xbf16> -> vector<4x64x32xbf16>
    %c0_13 = arith.constant 0 : index
    %c0_14 = arith.constant 0 : index
    %c0_15 = arith.constant 0 : index
    %c0_16 = arith.constant 0 : index
    %33 = vector.load %arg6[%c0_13, %c0_14, %c0_15, %c0_16] : memref<1x4x64x32xbf16, #tpu.memory_space<vmem>>, vector<1x4x64x32xbf16>
    %34 = vector.shape_cast %33 : vector<1x4x64x32xbf16> to vector<4x64x32xbf16>
    %35 = vector.shape_cast %32 : vector<4x64x32xbf16> to vector<1x4x64x32xbf16>
    tpu.vector_store %arg6[%c0_13, %c0_14, %c0_15, %c0_16], %35 {strides = array<i32>} : memref<1x4x64x32xbf16, #tpu.memory_space<vmem>>, vector<1x4x64x32xbf16>,
    %36 = vector.extract_strided_slice %29 {offsets = [0, 128], sizes = [64, 128], strides = [1, 1]} : vector<64x384xbf16> to vector<64x128xbf16>
    %37 = vector.shape_cast %36 : vector<64x128xbf16> to vector<64x4x32xbf16>
    %38 = tpu.transpose %37, [1, 0, 2] : vector<64x4x32xbf16> -> vector<4x64x32xbf16>
    %c0_17 = arith.constant 0 : index
    %c0_18 = arith.constant 0 : index
    %c0_19 = arith.constant 0 : index
    %c0_20 = arith.constant 0 : index
    %39 = vector.load %arg7[%c0_17, %c0_18, %c0_19, %c0_20] : memref<1x4x64x32xbf16, #tpu.memory_space<vmem>>, vector<1x4x64x32xbf16>
    %40 = vector.shape_cast %39 : vector<1x4x64x32xbf16> to vector<4x64x32xbf16>
    %41 = vector.shape_cast %38 : vector<4x64x32xbf16> to vector<1x4x64x32xbf16>
    tpu.vector_store %arg7[%c0_17, %c0_18, %c0_19, %c0_20], %41 {strides = array<i32>} : memref<1x4x64x32xbf16, #tpu.memory_space<vmem>>, vector<1x4x64x32xbf16>,
    %42 = vector.extract_strided_slice %29 {offsets = [0, 256], sizes = [64, 128], strides = [1, 1]} : vector<64x384xbf16> to vector<64x128xbf16>
    %43 = vector.shape_cast %42 : vector<64x128xbf16> to vector<64x4x32xbf16>
    %44 = tpu.transpose %43, [1, 0, 2] : vector<64x4x32xbf16> -> vector<4x64x32xbf16>
    %c0_21 = arith.constant 0 : index
    %c0_22 = arith.constant 0 : index
    %c0_23 = arith.constant 0 : index
    %c0_24 = arith.constant 0 : index
    %45 = vector.load %arg8[%c0_21, %c0_22, %c0_23, %c0_24] : memref<1x4x64x32xbf16, #tpu.memory_space<vmem>>, vector<1x4x64x32xbf16>
    %46 = vector.shape_cast %45 : vector<1x4x64x32xbf16> to vector<4x64x32xbf16>
    %47 = vector.shape_cast %44 : vector<4x64x32xbf16> to vector<1x4x64x32xbf16>
    tpu.vector_store %arg8[%c0_21, %c0_22, %c0_23, %c0_24], %47 {strides = array<i32>} : memref<1x4x64x32xbf16, #tpu.memory_space<vmem>>, vector<1x4x64x32xbf16>,
    return
  }
  func.func @transform_0(%arg0: i32, %arg1: i32) -> (i32, i32, i32) {
    %c0_i32 = arith.constant 0 : i32
    %c0_i32_0 = arith.constant 0 : i32
    return %arg0, %arg1, %c0_i32 : i32, i32, i32
  }
  func.func @transform_1(%arg0: i32, %arg1: i32) -> (i32, i32) {
    %c0_i32 = arith.constant 0 : i32
    %c0_i32_0 = arith.constant 0 : i32
    %c0_i32_1 = arith.constant 0 : i32
    return %c0_i32, %c0_i32_0 : i32, i32
  }
  func.func @transform_2(%arg0: i32, %arg1: i32) -> (i32, i32) {
    %c0_i32 = arith.constant 0 : i32
    %c0_i32_0 = arith.constant 0 : i32
    %c0_i32_1 = arith.constant 0 : i32
    return %c0_i32, %c0_i32_0 : i32, i32
  }
  func.func @transform_3(%arg0: i32, %arg1: i32) -> (i32, i32) {
    %c0_i32 = arith.constant 0 : i32
    %c0_i32_0 = arith.constant 0 : i32
    %c0_i32_1 = arith.constant 0 : i32
    return %c0_i32, %c0_i32_0 : i32, i32
  }
  func.func @transform_4(%arg0: i32, %arg1: i32) -> (i32, i32, i32, i32) {
    %c0_i32 = arith.constant 0 : i32
    %c0_i32_0 = arith.constant 0 : i32
    %c0_i32_1 = arith.constant 0 : i32
    return %arg0, %c0_i32, %arg1, %c0_i32_0 : i32, i32, i32, i32
  }
  func.func @transform_5(%arg0: i32, %arg1: i32) -> (i32, i32, i32, i32) {
    %c0_i32 = arith.constant 0 : i32
    %c0_i32_0 = arith.constant 0 : i32
    %c0_i32_1 = arith.constant 0 : i32
    return %arg0, %c0_i32, %arg1, %c0_i32_0 : i32, i32, i32, i32
  }
  func.func @transform_6(%arg0: i32, %arg1: i32) -> (i32, i32, i32, i32) {
    %c0_i32 = arith.constant 0 : i32
    %c0_i32_0 = arith.constant 0 : i32
    %c0_i32_1 = arith.constant 0 : i32
    return %arg0, %c0_i32, %arg1, %c0_i32_0 : i32, i32, i32, i32
  }
}

</mosaic_0001>

<bundles_post_ra>
// kernel: tpu_custom_call.1
= control target key start
LH: loop header
LB: loop body
LE: loop exit
PB: predicated region body
PF: predicated region fallthrough
CT: control target
= control target key end

     0   :  { %s6829_s0 = inlined_call_operand.hbm [shape: f32[2,128,128], index: 0, kind: input, shape index: {}]   ;;  %s6830_s1 = inlined_call_operand.vmem [shape: f32[1,128], index: 1, kind: input, shape index: {}]   ;;  %s6831_s2 = inlined_call_operand.vmem [shape: f32[1,128], index: 2, kind: input, shape index: {}]   ;;  %s6832_s3 = inlined_call_operand.hbm [shape: bf16[128,384], index: 3, kind: input, shape index: {}]   ;;  %s6833_s4 = inlined_call_operand.vmem [shape: bf16[2,4,128,32], index: 4, kind: output, shape index: {0}]   ;;  %s6834_s5 = inlined_call_operand.vmem [shape: bf16[2,4,128,32], index: 5, kind: output, shape index: {1}]   ;;  %s6835_s6 = inlined_call_operand.vmem [shape: bf16[2,4,128,32], index: 6, kind: output, shape index: {2}]  }
   0x1   :  { %6838 = sst [smem:[#allocation14_spill]] %s6832_s3 }
   0x2   :  { %6839 = sst [smem:[#allocation15_spill]] %s6833_s4 }
   0x3   :  { %6840 = sst [smem:[#allocation16_spill]] %s6834_s5 }
   0x4   :  { %6841 = sst [smem:[#allocation17_spill]] %s6835_s6 }
   0x5   :  { %12 = vsyncpa [#allocation3], 0 }
   0x6   :  { %14 = vsyncpa [#allocation3 + $0x1], 0 }
   0x7   :  { %15 = vsyncpa [#allocation5], 0  ;;  %s5587_s21 = smov 0   ;;  %s5589_s22 = smov 0  }
   0x8   :  { %s5591_s23 = smov 0   ;;  %s5593_s24 = smov 0  }
   0x9   :  { %s5595_s25 = smov 0   ;;  %s5597_s26 = smov 0  }
   0xa   :  { %s5599_s27 = smov 0   ;;  %s5601_s28 = smov 0  }
   0xb LB: > { %6842 = sst [smem:[#allocation11_spill]] %s5522_s24  ;;  %s5039_s29 = sadd.s32 4294967295, %s5538_s28   ;;  %s5538_s28 = sphi %s5601_s28, %s21_s28   ;;  %s5534_s27 = sphi %s5599_s27, %s6870_s27   ;;  %s5530_s26 = sphi %s5597_s26, %s6869_s26   ;;  %s5526_s25 = sphi %s5595_s25, %s6868_s25   ;;  %s5522_s24 = sphi %s5593_s24, %s6867_s24   ;;  %s5518_s23 = sphi %s5591_s23, %s6866_s23   ;;  %s5514_s22 = sphi %s5589_s22, %s6865_s22   ;;  %s5510_s21 = sphi %s5587_s21, %s6864_s21  }
   0xc   : > { %6843 = sst [smem:[#allocation12_spill]] %s5526_s25  ;;  %p55_p0 = scmp.ne.s32.totalorder %s5514_s22, %s5510_s21 }
   0xd   : > { %p5627_p1 = scmp.eq.s32.totalorder %s5039_s29, 0  ;;  %p5631_p2 = scmp.eq.s32.totalorder %s5039_s29, 3 }
   0xe   : > { %p5041_p3 = scmp.ge.s32.totalorder %s5538_s28, 1  ;;  %p213_p4 = scmp.lt.s32.totalorder %s5538_s28, 5 }
   0xf   : > { %p5639_p5 = por %p5627_p1, %p55_p0  ;;  %s5540_s10 = smov [#allocation4]  }
  0x10   : > { %p5643_p6 = pnand %p5041_p3, %p213_p4  ;;  %s231_s11 = sshll.u32 %s5540_s10, 4  ;;  %s232_s11 = int_to_ptr.vmem [resolvable:$true] %s231_s11 }
  0x11   : > { %s6846_s8 = scalar_select %p5639_p5, 1, 0 }
  0x12   : > { %p5280_p7 = pneg %p5643_p6  ;;  %s5425_s12 = scalar_lea.vmem %s232_s11, 3072 }
  0x13   : > { %p5426_p10 = scmp.ne.s32.totalorder %s232_s11, %s5425_s12  ;;  %p5433_p13 = scmp.lt.s32.totalorder %s232_s11, %s232_s11 }
  0x14   : > { %p5281_p8 = pnand %p5280_p7, %p5627_p1  ;;  %p5434_p0 = scmp.lt.s32.totalorder %s5425_s12, %s5425_s12 }
  0x16   : > { %p5416_p9 = pneg %p5281_p8  ;;  %p5435_p5 = por %p5434_p0, %p5433_p13 }
  0x18   : > { %p5428_p11 = pnand %p5426_p10, %p5416_p9 }
  0x1a   : > { %p5429_p12 = pneg %p5428_p11 }
  0x1c   : > { %p5436_p3 = pnand %p5435_p5, %p5429_p12 }
  0x1e   : > { %5439 = shalt.err (!%p5436_p3)
}
  0x1f   : > { %s5541_s13 = smov 192   ;;  %s5542_s14 = smov 12  }
  0x20   : > { %s6848_s3 = sld [smem:[#allocation14_spill]]  ;;  %s30_s17 = sadd.s32 1, %s5530_s26 }
  0x21   : > { %s33_s18 = sadd.s32 1, %s5534_s27  ;;  %p31_p4 = scmp.ge.s32.totalorder %s30_s17, 2 }
  0x22   : > { %s42_s19 = sadd.s32 1, %s5518_s23  ;;  %p49_p5 = scmp.ne.s32.totalorder %s5518_s23, %s5514_s22 }
  0x23   : > { %p50_p7 = scmp.eq.s32.totalorder %s5538_s28, 0  ;;  %s6872_s17 = smov (%p31_p4, %s30_s17), 0 }
  0x24   : > { %6849 = sst [smem:[#allocation13_spill]] %s6872_s17  ;;  %s6874_s18 = smov (!%p31_p4, %s33_s18), %s5534_s27 }
  0x25   : > { %s38_s20 = ssub.s32 %s5530_s26, %s6872_s17  ;;  %p5665_p9 = por %p50_p7, %p49_p5 }
  0x26   : > { %5283 = dma.hbm_to_vmem [thread:$0]  (!%p5281_p8), %s6848_s3, 3072, %s232_s11, [#allocation5], %s5541_s13, %s5541_s13, %s5542_s14  }
  0x27   : > { %p35_p8 = scmp.ge.s32.totalorder %s6874_s18, 2  ;;  %p5671_p10 = por %p5631_p2, %p49_p5 }
  0x28   : > { %p5289_p11 = scmp.lt.s32.totalorder %s5538_s28, 4  ;;  %s245_s10 = sand.u32 1, %s5518_s23  }
  0x29   : > { %s6876_s18 = smov (%p35_p8, %s6874_s18), 0  ;;  %s5044_s11 = sshll.u32 %s245_s10, 6 }
  0x2a   : > { %s37_s12 = ssub.s32 %s5534_s27, %s6876_s18  ;;  %s5045_s14 = sshll.u32 %s5530_s26, 3 }
  0x2b   : > { %s39_s13 = sor.u32 %s38_s20, %s37_s12  ;;  %s5046_s15 = sshll.u32 %s5534_s27, 4 }
  0x2c   : > { %p40_p12 = scmp.eq.s32.totalorder %s39_s13, 0  ;;  %s255_s16 = sadd.s32 %s5046_s15, %s5045_s14 }
  0x2d   : > { %s249_s3 = scalar_lea.vmem [#allocation2], %s5044_s11  ;;  %s5047_s6 = sshll.u32 %s255_s16, 7 }
  0x2e   : > { %s258_s7 = sshll.u32 %s249_s3, 4  ;;  %s257_s25 = scalar_lea.hbm %s6829_s0, %s5047_s6  ;;  %s259_s7 = int_to_ptr.vmem [resolvable:$true] %s258_s7 }
  0x2f   : > { %s5684_s17 = scalar_select %p40_p12, %s5518_s23, %s42_s19  }
  0x30   : > { %p5693_p2 = pnand %p5289_p11, %p5665_p9  ;;  %s246_s20 = scalar_lea.sflag [#allocation3], %s245_s10 }
  0x31   : > { %s5453_s11 = scalar_lea.vmem %s259_s7, 1024  ;;  %s5543_s3 = smov [#allocation2]  }
  0x32   : > { %p5442_p13 = pneg %p5693_p2  ;;  %p5454_p0 = scmp.ne.s32.totalorder %s259_s7, %s5453_s11 }
  0x33   : > { %s5458_s19 = sshll.u32 %s5543_s3, 4  ;;  %s5459_s19 = int_to_ptr.vmem [resolvable:$false] %s5458_s19 }
  0x34   : > { %p5456_p3 = pnand %p5454_p0, %p5442_p13  ;;  %s5460_s12 = scalar_lea.vmem %s5459_s19, 2048 }
  0x35   : > { %p5461_p5 = scmp.lt.s32.totalorder %s259_s7, %s5459_s19  ;;  %p5462_p7 = scmp.lt.s32.totalorder %s5460_s12, %s5453_s11 }
  0x36   : > { %p5457_p4 = pneg %p5456_p3 }
  0x37   : > { %p5463_p8 = por %p5462_p7, %p5461_p5 }
  0x39   : > { %p5464_p12 = pnand %p5463_p8, %p5457_p4 }
  0x3b   : > { %5467 = shalt.err (!%p5464_p12)
}
  0x3c   : > { %s5544_s4 = smov 128   ;;  %s5545_s5 = smov 8  }
  0x3d   : > { %5287 = dma.hbm_to_vmem [thread:$0]  (!%p5693_p2), %s257_s25, 1024, %s259_s7, %s246_s20, %s5544_s4, %s5544_s4, %s5545_s5  }
  0x3e   : > { %270 = sbr.rel (%p5643_p6) target bundleno = 994 (0x3e2), region = 36  ;;  %s5704_s6 = sand.u32 (!%p5643_p6), 1, %s5514_s22  }
  0x3f   : > { %s5049_s21 = sshll.u32 (!%p5643_p6), %s5704_s6, 6  ;;  %s273_s10 = scalar_lea.sflag (!%p5643_p6), [#allocation3], %s5704_s6 }
  0x40   : > { %s276_s13 = scalar_lea.vmem (!%p5643_p6), [#allocation2], %s5049_s21  ;;  %p6853_p9 = scmp.ne.s32.totalorder (!%p5643_p6), %s6846_s8, 0 }
  0x43   : > { %5501 = dma.done.wait (%p6853_p9), %s273_s10, 1024  }
  0x44   : > { %5503 = vsyncadd (%p6853_p9), %s273_s10, 4294966272 }
  0x45   : > { %5505 = dma.done.wait (%p5627_p1), [#allocation5], 3072  }
  0x46   : > { %5507 = vsyncadd (%p5627_p1), [#allocation5], 4294964224  ;;  %v321_v0 = vld [vmem:[%s276_s13] sm:$0xff]  ;;  %v323_v1 = vld [vmem:[%s276_s13 + $0x10] sm:$0xff]  ;;  %v5546_v62 = vmov 0   ;;  %s5547_s9 = smov 96  }
  0x47   : > { %331 = vadd.xlane.f32.xlu0 %v321_v0  ;;  %335 = vadd.xlane.f32.xlu1 %v323_v1  ;;  %v322_v2 = vld [vmem:[%s276_s13 + $0x8] sm:$0xff]  ;;  %v324_v3 = vld [vmem:[%s276_s13 + $0x18] sm:$0xff]  ;;  %v325_v4 = vld [vmem:[%s276_s13 + $0x20] sm:$0xff]  ;;  %s5548_s14 = smov 64   ;;  %s5549_s15 = smov 32   ;;  %vm1932_vm0 = vcmask 257024  }
  0x48   : > { %v326_v5 = vld [vmem:[%s276_s13 + $0x28] sm:$0xff]  ;;  %v327_v6 = vld [vmem:[%s276_s13 + $0x30] sm:$0xff]  ;;  %v328_v7 = vld [vmem:[%s276_s13 + $0x38] sm:$0xff]  ;;  %644 = vmatprep.mubr.bf16.mxu0 %v5546_v62  ;;  %s5950_s16 = sshll.u32 %s5704_s6, 7  ;;  %s6854_s3 = sld [smem:[#allocation11_spill]] (%p5671_p10) }
  0x49   : > { %v5366_v8 = vld [vmem:[#allocation4 + $0xac] ss:$12 sps:$4 sm:$0xff]   ;;  %v5368_v9 = vld [vmem:[#allocation4 + $0xa8] ss:$12 sps:$4 sm:$0xff]   ;;  %v5371_v42 = vld [vmem:[#allocation4 + $0xb0] ss:$12 sps:$4 sm:$0xff]  }
  0x4a   : > { %612 = vmatprep.subr.bf16.mxu0 %v5366_v8  ;;  %v5369_v41 = vld [vmem:[#allocation4 + $0x94] ss:$12 sps:$4 sm:$0xff]   ;;  %v5372_v43 = vld [vmem:[#allocation4 + $0x90] ss:$12 sps:$4 sm:$0xff]   ;;  %5250 = vmatprep.subr.bf16.mxu1 %v5371_v42  ;;  %v5375_v46 = vld [vmem:[#allocation4 + $0x98] ss:$12 sps:$4 sm:$0xff]  }
  0x4b   : > { %333 = vadd.xlane.f32.xlu0 %v322_v2  ;;  %337 = vadd.xlane.f32.xlu1 %v324_v3  ;;  %v5373_v45 = vld [vmem:[#allocation4 + $0x7c] ss:$12 sps:$4 sm:$0xff]   ;;  %v5376_v47 = vld [vmem:[#allocation4 + $0x78] ss:$12 sps:$4 sm:$0xff]   ;;  %v5379_v49 = vld [vmem:[#allocation4 + $0x80] ss:$12 sps:$4 sm:$0xff]  }
  0x4c   : > { %613 = vmatpush1.bf16.msra.mxu0 %v5368_v9  ;;  %5251 = vmatpush3.bf16.msra.mxu1 %v5371_v42  ;;  %v5377_v48 = vld [vmem:[#allocation4 + $0x64] ss:$12 sps:$4 sm:$0xff]   ;;  %v5380_v50 = vld [vmem:[#allocation4 + $0x60] ss:$12 sps:$4 sm:$0xff]   ;;  %v5383_v52 = vld [vmem:[#allocation4 + $0x68] ss:$12 sps:$4 sm:$0xff]  }
  0x4d   : > { %614 = vmatprep.subr.bf16.mxu0 %v5369_v41  ;;  %5252 = vmatprep.subr.bf16.mxu1 %v5375_v46  ;;  %v5381_v51 = vld [vmem:[#allocation4 + $0x4c] ss:$12 sps:$4 sm:$0xff]   ;;  %v5384_v53 = vld [vmem:[#allocation4 + $0x48] ss:$12 sps:$4 sm:$0xff]   ;;  %v5387_v55 = vld [vmem:[#allocation4 + $0x50] ss:$12 sps:$4 sm:$0xff]  }
  0x4e   : > { %v5385_v54 = vld [vmem:[#allocation4 + $0x34] ss:$12 sps:$4 sm:$0xff]   ;;  %v5388_v56 = vld [vmem:[#allocation4 + $0x30] ss:$12 sps:$4 sm:$0xff]   ;;  %v5391_v58 = vld [vmem:[#allocation4 + $0x38] ss:$12 sps:$4 sm:$0xff]  }
  0x4f   : > { %339 = vadd.xlane.f32.xlu0 %v325_v4  ;;  %341 = vadd.xlane.f32.xlu1 %v326_v5  ;;  %v5389_v57 = vld [vmem:[#allocation4 + $0x1c] ss:$12 sps:$4 sm:$0xff]   ;;  %v5392_v59 = vld [vmem:[#allocation4 + $0x18] ss:$12 sps:$4 sm:$0xff]   ;;  %v5395_v61 = vld [vmem:[#allocation4 + $0x20] ss:$12 sps:$4 sm:$0xff]  }
  0x50   : > { %615 = vmatpush1.bf16.msra.mxu0 %v5372_v43  ;;  %5253 = vmatpush3.bf16.msra.mxu1 %v5375_v46  ;;  %v5393_v60 = vld [vmem:[#allocation4 + $0x4] ss:$12 sps:$4 sm:$0xff]   ;;  %v5396_v63 = vld [vmem:[#allocation4] ss:$12 sps:$4 sm:$0xff]   ;;  %s5961_s7 = scalar_lea.vmem [#allocation6], %s5950_s16  ;;  %s6028_s20 = scalar_lea.vmem [#allocation8], %s5950_s16 }
  0x51   : > { %616 = vmatprep.subr.bf16.mxu0 %v5373_v45  ;;  %5254 = vmatprep.subr.bf16.mxu1 %v5379_v49  ;;  %s6111_s11 = scalar_lea.vmem [#allocation7], %s5950_s16  ;;  %s6855_s19 = sld [smem:[#allocation12_spill]] (%p5671_p10) }
  0x52   : > { %s5227_s12 = sshll.u32 (%p5671_p10), %s6854_s3, 3  ;;  %s6856_s13 = sld [smem:[#allocation15_spill]] (%p5671_p10) }
  0x53   : > { %343 = vadd.xlane.f32.xlu0 %v327_v6  ;;  %345 = vadd.xlane.f32.xlu1 %v328_v7 }
  0x54   : > { %617 = vmatpush1.bf16.msra.mxu0 %v5376_v47  ;;  %5255 = vmatpush3.bf16.msra.mxu1 %v5379_v49 }
  0x55   : > { %618 = vmatprep.subr.bf16.mxu0 %v5377_v48  ;;  %5256 = vmatprep.subr.bf16.mxu1 %v5383_v52 }
  0x57   : > { %s5228_s4 = sshll.u32 (%p5671_p10), %s6855_s19, 6 }
  0x58   : > { %619 = vmatpush1.bf16.msra.mxu0 %v5380_v50  ;;  %5257 = vmatpush3.bf16.msra.mxu1 %v5383_v52  ;;  %s4374_s5 = sadd.s32 (%p5671_p10), %s5228_s4, %s5227_s12 }
  0x59   : > { %620 = vmatprep.subr.bf16.mxu0 %v5381_v51  ;;  %5258 = vmatprep.subr.bf16.mxu1 %v5387_v55  ;;  %s5229_s6 = sshll.u32 (%p5671_p10), %s4374_s5, 2 }
  0x5a   : > { %s4376_s24 = scalar_lea.vmem (%p5671_p10), %s6856_s13, %s5229_s6 }
  0x5c   : > { %621 = vmatpush1.bf16.msra.mxu0 %v5384_v53  ;;  %5259 = vmatpush3.bf16.msra.mxu1 %v5387_v55 }
  0x5d   : > { %622 = vmatprep.subr.bf16.mxu0 %v5385_v54  ;;  %5260 = vmatprep.subr.bf16.mxu1 %v5391_v58 }
  0x60   : > { %623 = vmatpush1.bf16.msra.mxu0 %v5388_v56  ;;  %5261 = vmatpush3.bf16.msra.mxu1 %v5391_v58 }
  0x61   : > { %624 = vmatprep.subr.bf16.mxu0 %v5389_v57  ;;  %5262 = vmatprep.subr.bf16.mxu1 %v5395_v61 }
  0x64   : > { %625 = vmatpush1.bf16.msra.mxu0 %v5392_v59  ;;  %5263 = vmatpush3.bf16.msra.mxu1 %v5395_v61 }
  0x65   : > { %626 = vmatprep.subr.bf16.mxu0 %v5393_v60 }
  0x68   : > { %627 = vmatpush1.bf16.msra.mxu0 %v5396_v63 }
  0xd0   : > { %v332_v10 = vpop.xlane.xlu0 %331  ;;  %v336_v11 = vpop.xlane.xlu1 %335 }
  0xd1   : > { %v348_v12 = vmul.f32 0.0078125, %v332_v10  ;;  %v350_v13 = vmul.f32 0.0078125, %v336_v11 }
  0xd3   : > { %v5716_v14 = vsub.f32 %v321_v0, %v348_v12  ;;  %v5718_v15 = vsub.f32 %v323_v1, %v350_v13  ;;  %v5397_v0 = vld [vmem:[#allocation4 + $0x8] ss:$12 sps:$4 sm:$0xff]  }
  0xd4   : > { %v334_v16 = vpop.xlane.xlu0 %333  ;;  %v338_v17 = vpop.xlane.xlu1 %337  ;;  %5264 = vmatprep.subr.bf16.mxu1 %v5397_v0 }
  0xd5   : > { %v349_v18 = vmul.f32 0.0078125, %v334_v16  ;;  %v364_v19 = vmul.f32 %v5716_v14, %v5716_v14  ;;  %v351_v20 = vmul.f32 0.0078125, %v338_v17  ;;  %v366_v23 = vmul.f32 %v5718_v15, %v5718_v15  ;;  %5265 = vmatpush3.bf16.msra.mxu1 %v5397_v0 }
  0xd7   : > { %v5722_v21 = vsub.f32 %v322_v2, %v349_v18  ;;  %372 = vadd.xlane.f32.xlu0 %v364_v19  ;;  %v5724_v22 = vsub.f32 %v324_v3, %v351_v20 }
  0xd8   : > { %v340_v24 = vpop.xlane.xlu0 %339  ;;  %v342_v25 = vpop.xlane.xlu1 %341 }
  0xd9   : > { %v352_v26 = vmul.f32 0.0078125, %v340_v24  ;;  %v365_v27 = vmul.f32 %v5722_v21, %v5722_v21  ;;  %v353_v28 = vmul.f32 0.0078125, %v342_v25  ;;  %v367_v31 = vmul.f32 %v5724_v22, %v5724_v22 }
  0xdb   : > { %v5730_v29 = vsub.f32 %v325_v4, %v352_v26  ;;  %376 = vadd.xlane.f32.xlu0 %v366_v23  ;;  %374 = vadd.xlane.f32.xlu1 %v365_v27  ;;  %v5732_v30 = vsub.f32 %v326_v5, %v353_v28 }
  0xdc   : > { %v344_v32 = vpop.xlane.xlu0 %343  ;;  %v346_v33 = vpop.xlane.xlu1 %345 }
  0xdd   : > { %v354_v34 = vmul.f32 0.0078125, %v344_v32  ;;  %v368_v35 = vmul.f32 %v5730_v29, %v5730_v29  ;;  %v355_v36 = vmul.f32 0.0078125, %v346_v33  ;;  %v369_v39 = vmul.f32 %v5732_v30, %v5732_v30  ;;  %v5054_v33 = vld [vmem:[%s6830_s1] ss:$0 sm:$0xff] }
  0xdf   : > { %v5738_v37 = vsub.f32 %v327_v6, %v354_v34  ;;  %378 = vadd.xlane.f32.xlu1 %v367_v31  ;;  %380 = vadd.xlane.f32.xlu0 %v368_v35  ;;  %v5740_v38 = vsub.f32 %v328_v7, %v355_v36 }
  0xe1   : > { %v370_v40 = vmul.f32 %v5738_v37, %v5738_v37  ;;  %v371_v44 = vmul.f32 %v5740_v38, %v5740_v38 }
  0xe3   : > { %382 = vadd.xlane.f32.xlu1 %v369_v39  ;;  %384 = vadd.xlane.f32.xlu0 %v370_v40  ;;  %v5055_v40 = vld [vmem:[%s6831_s2] ss:$0 sm:$0xff] }
  0xe7   : > { %386 = vadd.xlane.f32.xlu1 %v371_v44 }
 0x160   : > { %v373_v1 = vpop.xlane.xlu0 %372 }
 0x161   : > { %v388_v2 = vmul.f32 0.0078125, %v373_v1 }
 0x163   : > { %v396_v3 = vadd.f32 1e-05, %v388_v2 }
 0x164   : > { %v375_v4 = vpop.xlane.xlu1 %374  ;;  %v377_v5 = vpop.xlane.xlu0 %376 }
 0x165   : > { %5398 = vrsqrt.f32 %v396_v3  ;;  %v389_v6 = vmul.f32 0.0078125, %v375_v4  ;;  %v390_v7 = vmul.f32 0.0078125, %v377_v5 }
 0x167   : > { %v397_v8 = vadd.f32 1e-05, %v389_v6  ;;  %v398_v9 = vadd.f32 1e-05, %v390_v7 }
 0x168   : > { %v379_v10 = vpop.xlane.xlu1 %378  ;;  %v381_v11 = vpop.xlane.xlu0 %380 }
 0x169   : > { %5400 = vrsqrt.f32 %v397_v8  ;;  %v391_v12 = vmul.f32 0.0078125, %v379_v10  ;;  %v392_v13 = vmul.f32 0.0078125, %v381_v11 }
 0x16a   : > { %5402 = vrsqrt.f32 %v398_v9 }
 0x16b   : > { %v399_v16 = vadd.f32 1e-05, %v391_v12  ;;  %v400_v17 = vadd.f32 1e-05, %v392_v13 }
 0x16c   : > { %v383_v18 = vpop.xlane.xlu1 %382  ;;  %v385_v19 = vpop.xlane.xlu0 %384 }
 0x16d   : > { %5404 = vrsqrt.f32 %v399_v16  ;;  %v393_v20 = vmul.f32 0.0078125, %v383_v18  ;;  %v394_v23 = vmul.f32 0.0078125, %v385_v19 }
 0x16e   : > { %5406 = vrsqrt.f32 %v400_v17 }
 0x16f   : > { %v401_v24 = vadd.f32 1e-05, %v393_v20  ;;  %v402_v25 = vadd.f32 1e-05, %v394_v23 }
 0x170   : > { %v387_v26 = vpop.xlane.xlu1 %386 }
 0x171   : > { %5408 = vrsqrt.f32 %v401_v24  ;;  %v395_v27 = vmul.f32 0.0078125, %v387_v26 }
 0x172   : > { %v5399_v28 = vpop.eup %5398  ;;  %5410 = vrsqrt.f32 %v402_v25 }
 0x173   : > { %v403_v31 = vadd.f32 1e-05, %v395_v27  ;;  %v412_v32 = vmul.f32 %v5399_v28, %v5716_v14 }
 0x175   : > { %5412 = vrsqrt.f32 %v403_v31  ;;  %v426_v39 = vmul.f32 %v5054_v33, %v412_v32 }
 0x176   : > { %v5401_v34 = vpop.eup %5400 }
 0x177   : > { %v5403_v35 = vpop.eup %5402  ;;  %v413_v36 = vmul.f32 %v5401_v34, %v5722_v21  ;;  %v440_v45 = vadd.f32 %v5055_v40, %v426_v39 }
 0x178   : > { %v414_v41 = vmul.f32 %v5403_v35, %v5718_v15 }
 0x179   : > { %v427_v42 = vmul.f32 %v5054_v33, %v413_v36 }
 0x17a   : > { %v5405_v43 = vpop.eup %5404  ;;  %v428_v44 = vmul.f32 %v5054_v33, %v414_v41 }
 0x17b   : > { %v5407_v14 = vpop.eup %5406  ;;  %v441_v46 = vadd.f32 %v5055_v40, %v427_v42  ;;  %v415_v47 = vmul.f32 %v5405_v43, %v5724_v22 }
 0x17c   : > { %v416_v48 = vmul.f32 %v5407_v14, %v5730_v29  ;;  %v442_v51 = vadd.f32 %v5055_v40, %v428_v44  ;;  %v864_v44 = vlaneseq  ;;  %v5550_v14 = vmov 1983009808  }
 0x17d   : > { %v448_v49 = vpack.c.bf16 %v441_v46, %v440_v45  ;;  %v429_v50 = vmul.f32 %v5054_v33, %v415_v47  ;;  %v862_v45 = vunpack.c.l.s4 %v5550_v14  ;;  %v5551_v46 = vmov 1934713408  }
 0x17e   : > { %v5409_v21 = vpop.eup %5408  ;;  %v430_v54 = vmul.f32 %v5054_v33, %v416_v48  ;;  %v893_v47 = vunpack.c.l.s4 %v5551_v46  ;;  %v865_v48 = vshrl.u32 %v864_v44, 7 }
 0x17f   : > { %v5411_v52 = vpop.eup %5410  ;;  %645 = vmatmul.mubr.bf16.vlgmr.msra.gmra.mxu0 %v448_v49  ;;  %5266 = vmatprep.mubr.bf16.mxu1 %v448_v49  ;;  %v443_v53 = vadd.f32 %v5055_v40, %v429_v50  ;;  %v417_v15 = vmul.f32 %v5409_v21, %v5732_v30  ;;  %v863_v21 = vunpack.c.0.s8 %v862_v45 }
 0x180   : > { %654 = vmatprep.mubr.bf16.mxu0 %v5546_v62  ;;  %v418_v55 = vmul.f32 %v5411_v52, %v5738_v37  ;;  %v444_v29 = vadd.f32 %v5055_v40, %v430_v54  ;;  %v894_v52 = vunpack.c.0.s8 %v893_v47 }
 0x181   : > { %v449_v56 = vpack.c.bf16 %v443_v53, %v442_v51  ;;  %v431_v57 = vmul.f32 %v5054_v33, %v417_v15  ;;  %v5865_v53 = vpack.i.b16 %v5546_v62, %v5546_v62 }
 0x182   : > { %v5413_v22 = vpop.eup %5412  ;;  %v432_v60 = vmul.f32 %v5054_v33, %v418_v55 }
 0x183   : > { %5267 = vmatmul.mubr.bf16.vlgmr.msra.gmra.mxu1 %v449_v56  ;;  %v445_v58 = vadd.f32 %v5055_v40, %v431_v57  ;;  %v419_v59 = vmul.f32 %v5413_v22, %v5740_v38  ;;  %v5868_v57 = vsub.s32 %v863_v21, %v865_v48 }
 0x184   : > { %v446_v0 = vadd.f32 %v5055_v40, %v432_v60 }
 0x185   : > { %v450_v61 = vpack.c.bf16 %v445_v58, %v444_v29  ;;  %v433_v63 = vmul.f32 %v5054_v33, %v419_v59  ;;  %v5871_v29 = vsub.s32 %v894_v52, %v865_v48 }
 0x187   : > { %655 = vmatmul.mubr.bf16.gmra.mxu0 %v449_v56  ;;  %5270 = vmatprep.mubr.bf16.mxu1 %v450_v61  ;;  %v447_v30 = vadd.f32 %v5055_v40, %v433_v63 }
 0x188   : > { %664 = vmatprep.mubr.bf16.mxu0 %v5546_v62 }
 0x189   : > { %v451_v1 = vpack.c.bf16 %v447_v30, %v446_v0 }
 0x18b   : > { %5271 = vmatmul.mubr.bf16.gmra.mxu1 %v451_v1 }
 0x18f   : > { %665 = vmatmul.mubr.bf16.gmra.mxu0 %v450_v61 }
 0x190   : > { %674 = vmatprep.mubr.bf16.mxu0 %v5546_v62 }
 0x197   : > { %675 = vmatmul.mubr.bf16.gmra.mxu0 %v451_v1 }
 0x23f   : > { %v646_v37 = vpop.f32.mrf.mxu0 }
 0x241   : > { %v648_v2 = vpop.f32.mrf.mxu0 }
 0x243   : > { %v650_v3 = vpop.f32.mrf.mxu0  ;;  %v5268_v4 = vpop.f32.mrf.mxu1 }
 0x244   : > { %v5766_v38 = vpack.c.bf16 %v650_v3, %v646_v37 }
 0x245   : > { %v652_v5 = vpop.f32.mrf.mxu0  ;;  %v719_v6 = vpop.f32.mrf.mxu1 }
 0x246   : > { %766 = vrot.lane.b32.xlu0 %v5766_v38, %s5547_s9  ;;  %v5780_v11 = vpack.c.bf16 %v652_v5, %v648_v2  ;;  %v794_v50 = vshrl.u32 %v5766_v38, 16 }
 0x247   : > { %v5269_v7 = vpop.f32.mrf.mxu1  ;;  %v656_v9 = vpop.f32.mrf.mxu0 }
 0x248   : > { %v5770_v8 = vpack.c.bf16 %v5269_v7, %v5268_v4  ;;  %v1997_v58 = vshrl.u32 %v5780_v11, 16 }
 0x249   : > { %v658_v10 = vpop.f32.mrf.mxu0  ;;  %v722_v12 = vpop.f32.mrf.mxu1 }
 0x24a   : > { %774 = vrot.lane.b32.xlu0 %v5766_v38, %s5548_s14  ;;  %3167 = vrot.lane.b32.xlu1 %v5770_v8, %s5547_s9  ;;  %v5796_v20 = vpack.c.bf16 %v722_v12, %v719_v6  ;;  %v3209_v62 = vshrl.u32 %v5770_v8, 16 }
 0x24b   : > { %v660_v13 = vpop.f32.mrf.mxu0  ;;  %v5272_v17 = vpop.f32.mrf.mxu1 }
 0x24c   : > { %v5786_v16 = vpack.c.bf16 %v660_v13, %v656_v9  ;;  %v3193_v0 = vshrl.u32 %v5796_v20, 16 }
 0x24d   : > { %v662_v18 = vpop.f32.mrf.mxu0  ;;  %v735_v19 = vpop.f32.mrf.mxu1 }
 0x24e   : > { %782 = vrot.lane.b32.xlu0 %v5766_v38, %s5549_s15  ;;  %3175 = vrot.lane.b32.xlu1 %v5770_v8, %s5548_s14  ;;  %v5812_v31 = vpack.c.bf16 %v662_v18, %v658_v10  ;;  %v816_v63 = vshrl.u32 %v5786_v16, 16 }
 0x24f   : > { %v666_v23 = vpop.f32.mrf.mxu0  ;;  %v5273_v24 = vpop.f32.mrf.mxu1 }
 0x250   : > { %v5802_v25 = vpack.c.bf16 %v5273_v24, %v5272_v17  ;;  %v2013_v1 = vshrl.u32 %v5812_v31, 16 }
 0x251   : > { %v668_v26 = vpop.f32.mrf.mxu0  ;;  %v738_v27 = vpop.f32.mrf.mxu1 }
 0x252   : > { %1969 = vrot.lane.b32.xlu0 %v5780_v11, %s5547_s9  ;;  %3183 = vrot.lane.b32.xlu1 %v5770_v8, %s5549_s15  ;;  %v5814_v32 = vpack.c.bf16 %v738_v27, %v735_v19  ;;  %v3241_v30 = vshrl.u32 %v5802_v25, 16 }
 0x253   : > { %v670_v28 = vpop.f32.mrf.mxu0 }
 0x254   : > { %v5824_v35 = vpack.c.bf16 %v670_v28, %v666_v23 }
 0x255   : > { %v672_v33 = vpop.f32.mrf.mxu0 }
 0x256   : > { %1977 = vrot.lane.b32.xlu0 %v5780_v11, %s5548_s14  ;;  %768 = vrot.lane.b32.xlu1 %v5786_v16, %s5547_s9  ;;  %v5834_v40 = vpack.c.bf16 %v672_v33, %v668_v26  ;;  %v832_v5 = vshrl.u32 %v5824_v35, 16 }
 0x257   : > { %v676_v34 = vpop.f32.mrf.mxu0 }
 0x259   : > { %v678_v36 = vpop.f32.mrf.mxu0 }
 0x25a   : > { %1985 = vrot.lane.b32.xlu0 %v5780_v11, %s5549_s15  ;;  %776 = vrot.lane.b32.xlu1 %v5786_v16, %s5548_s14 }
 0x25b   : > { %v680_v39 = vpop.f32.mrf.mxu0 }
 0x25c   : > { %v5836_v41 = vpack.c.bf16 %v680_v39, %v676_v34 }
 0x25d   : > { %v682_v42 = vpop.f32.mrf.mxu0 }
 0x25e   : > { %3165 = vrot.lane.b32.xlu0 %v5796_v20, %s5547_s9  ;;  %784 = vrot.lane.b32.xlu1 %v5786_v16, %s5549_s15  ;;  %v5850_v43 = vpack.c.bf16 %v682_v42, %v678_v36 }
 0x262   : > { %3173 = vrot.lane.b32.xlu0 %v5796_v20, %s5548_s14  ;;  %3171 = vrot.lane.b32.xlu1 %v5802_v25, %s5547_s9 }
 0x266   : > { %3181 = vrot.lane.b32.xlu0 %v5796_v20, %s5549_s15  ;;  %3179 = vrot.lane.b32.xlu1 %v5802_v25, %s5548_s14 }
 0x26a   : > { %1971 = vrot.lane.b32.xlu1 %v5812_v31, %s5547_s9  ;;  %3169 = vrot.lane.b32.xlu0 %v5814_v32, %s5547_s9 }
 0x26e   : > { %1979 = vrot.lane.b32.xlu1 %v5812_v31, %s5548_s14  ;;  %3177 = vrot.lane.b32.xlu0 %v5814_v32, %s5548_s14 }
 0x272   : > { %1987 = vrot.lane.b32.xlu1 %v5812_v31, %s5549_s15  ;;  %778 = vrot.lane.b32.xlu0 %v5824_v35, %s5548_s14 }
 0x276   : > { %770 = vrot.lane.b32.xlu1 %v5824_v35, %s5547_s9  ;;  %786 = vrot.lane.b32.xlu0 %v5824_v35, %s5549_s15 }
 0x27a   : > { %1973 = vrot.lane.b32.xlu0 %v5834_v40, %s5547_s9  ;;  %772 = vrot.lane.b32.xlu1 %v5836_v41, %s5547_s9 }
 0x27e   : > { %1981 = vrot.lane.b32.xlu0 %v5834_v40, %s5548_s14  ;;  %780 = vrot.lane.b32.xlu1 %v5836_v41, %s5548_s14 }
 0x282   : > { %1989 = vrot.lane.b32.xlu0 %v5834_v40, %s5549_s15  ;;  %788 = vrot.lane.b32.xlu1 %v5836_v41, %s5549_s15 }
 0x286   : > { %3185 = vrot.lane.b32.xlu0 %v5814_v32, %s5549_s15  ;;  %1975 = vrot.lane.b32.xlu1 %v5850_v43, %s5547_s9 }
 0x28a   : > { %1983 = vrot.lane.b32.xlu1 %v5850_v43, %s5548_s14 }
 0x28e   : > { %1991 = vrot.lane.b32.xlu1 %v5850_v43, %s5549_s15 }
 0x292   : > { %3187 = vrot.lane.b32.xlu1 %v5802_v25, %s5549_s15 }
 0x2b8   : > { %v767_v49 = vpop.permute.xlu0 %766 }
 0x2b9   : > { %v795_v51 = vshrl.u32 %v767_v49, 16  ;;  %v792_v15 = vpack.i.b16 %v767_v49, %v5766_v38  ;;  %v3225_v38 = vshrl.u32 %v5814_v32, 16 }
 0x2bb   : > { %v796_v54 = vpack.i.b16 %v795_v51, %v794_v50  ;;  %v860_v59 = vcombine.high %v792_v15, %v5865_v53  ;;  %v867_v6 = vrot.slane %v792_v15, %v5868_v57 }
 0x2bc   : > { %v3168_v55 = vpop.permute.xlu1 %3167  ;;  %v775_v56 = vpop.permute.xlu0 %774 }
 0x2bd   : > { %v3207_v22 = vpack.i.b16 %v3168_v55, %v5770_v8  ;;  %v926_v60 = vcombine.high %v796_v54, %v5865_v53  ;;  %v3210_v61 = vshrl.u32 %v3168_v55, 16  ;;  %v802_v7 = vshrl.u32 %v775_v56, 16 }
 0x2be   : > { %v874_v10 = vrot.slane %v860_v59, %v5868_v57  ;;  %v933_v12 = vrot.slane %v796_v54, %v5868_v57 }
 0x2bf   : > { %v3211_v37 = vpack.i.b16 %v3210_v61, %v3209_v62  ;;  %v3385_v2 = vcombine.high %v3207_v22, %v5865_v53  ;;  %v940_v13 = vrot.slane %v926_v60, %v5868_v57  ;;  %v5890_v18 = vrot.slane %v3207_v22, %v5868_v57 }
 0x2c0   : > { %v3176_v3 = vpop.permute.xlu1 %3175  ;;  %v783_v4 = vpop.permute.xlu0 %782 }
 0x2c1   : > { %v800_v8 = vpack.i.b16 %v783_v4, %v775_v56  ;;  %v803_v9 = vshrl.u32 %v783_v4, 16  ;;  %v3451_v17 = vcombine.high %v3211_v37, %v5865_v53  ;;  %v5895_v26 = vrot.slane %v3385_v2, %v5868_v57 }
 0x2c2   : > { %v5898_v27 = vrot.slane %v3211_v37, %v5868_v57  ;;  %v3217_v33 = vshrl.u32 %v3176_v3, 16 }
 0x2c3   : > { %v804_v19 = vpack.i.b16 %v803_v9, %v802_v7  ;;  %v875_v23 = vcombine.high %v800_v8, %v5865_v53  ;;  %v882_v24 = vrot.slane %v800_v8, %v5868_v57  ;;  %v5901_v28 = vrot.slane %v3451_v17, %v5868_v57 }
 0x2c4   : > { %v3184_v34 = vpop.permute.xlu1 %3183  ;;  %v5903_v36 = vpop.permute.xlu0 %1969 }
 0x2c5   : > { %v889_v39 = vrot.slane %v875_v23, %v5868_v57  ;;  %v890_v42 = vcombine.low %v867_v6, %v882_v24  ;;  %v891_v44 = vcombine.high %v867_v6, %v882_v24  ;;  %v941_v14 = vcombine.high %v804_v19, %v5865_v53 }
 0x2c6   : > { %v948_v45 = vrot.slane %v804_v19, %v5868_v57  ;;  %v3215_v46 = vpack.i.b16 %v3184_v34, %v3176_v3  ;;  %v3218_v47 = vshrl.u32 %v3184_v34, 16  ;;  %v5910_v48 = vpack.i.b16 %v5903_v36, %v5780_v11 }
 0x2c7   : > { %v898_v49 = vrot.slane %v890_v42, %v5871_v29  ;;  %v905_v50 = vrot.slane %v891_v44, %v5871_v29  ;;  %v906_v21 = vcombine.low %v874_v10, %v889_v39  ;;  %v907_v51 = vcombine.high %v874_v10, %v889_v39 }
 0x2c8   : > { %v955_v52 = vrot.slane %v941_v14, %v5868_v57  ;;  %v956_v15 = vcombine.low %v933_v12, %v948_v45  ;;  %v957_v54 = vcombine.high %v933_v12, %v948_v45  ;;  %v3219_v55 = vpack.i.b16 %v3218_v47, %v3217_v33 }
 0x2c9   : > { %v914_v56 = vrot.slane %v906_v21, %v5871_v29  ;;  %v921_v22 = vrot.slane %v907_v51, %v5871_v29  ;;  %v1388_v59 = vcombine.low %v898_v49, %v905_v50  ;;  %v5080_v60 = vcombine.high %v898_v49, %v905_v50 }
 0x2ca   : > { %v964_v62 = vrot.slane %v956_v15, %v5871_v29  ;;  %v971_v61 = vrot.slane %v957_v54, %v5871_v29  ;;  %v972_v37 = vcombine.low %v940_v13, %v955_v52  ;;  %v973_v2 = vcombine.high %v940_v13, %v955_v52 }
 0x2cb   : > { %v1395_v3 = vrot.slane %v1388_v59, %v5868_v57  ;;  %v1403_v4 = vrot.slane %v5080_v60, %v5868_v57  ;;  %v1404_v6 = vcombine.low %v914_v56, %v921_v22  ;;  %v5081_v7 = vcombine.high %v914_v56, %v921_v22 }
 0x2cc   : > { %v980_v8 = vrot.slane %v972_v37, %v5871_v29  ;;  %v987_v9 = vrot.slane %v973_v2, %v5871_v29  ;;  %v1438_v10 = vcombine.low %v964_v62, %v971_v61  ;;  %v5082_v12 = vcombine.high %v964_v62, %v971_v61 }
 0x2cd   : > { %v1411_v17 = vrot.slane %v1404_v6, %v5868_v57  ;;  %v1419_v19 = vrot.slane %v5081_v7, %v5868_v57  ;;  %v1420_v23 = vcombine.low %v1395_v3, %v1403_v4  ;;  %v3400_v24 = vcombine.high %v3215_v46, %v5865_v53 }
 0x2ce   : > { %v1445_v13 = vrot.slane %v1438_v10, %v5868_v57  ;;  %v1453_v33 = vrot.slane %v5082_v12, %v5868_v57  ;;  %v1454_v34 = vcombine.low %v980_v8, %v987_v9  ;;  %v5083_v39 = vcombine.high %v980_v8, %v987_v9 }
 0x2cf   : > { %v1427_v42 = vrot.slane %v1420_v23, %v5871_v29  ;;  %v1428_v44 = vcombine.low %v1411_v17, %v1419_v19  ;;  %v3407_v14 = vrot.slane %v3215_v46, %v5868_v57  ;;  %v3414_v45 = vrot.slane %v3400_v24, %v5868_v57 }
 0x2d0   : > { %v1461_v47 = vrot.slane %v1454_v34, %v5868_v57  ;;  %v1469_v49 = vrot.slane %v5083_v39, %v5868_v57  ;;  %v1470_v50 = vcombine.low %v1445_v13, %v1453_v33  ;;  %v3466_v21 = vcombine.high %v3219_v55, %v5865_v53 }
 0x2d1   : > { %v1435_v51 = vrot.slane %v1428_v44, %v5871_v29  ;;  %v3415_v52 = vcombine.low %v5890_v18, %v3407_v14  ;;  %v3416_v15 = vcombine.high %v5890_v18, %v3407_v14  ;;  %v3431_v54 = vcombine.low %v5895_v26, %v3414_v45 }
 0x2d2   : > { %v1477_v46 = vrot.slane %v1470_v50, %v5871_v29  ;;  %v1478_v56 = vcombine.low %v1461_v47, %v1469_v49  ;;  %v3432_v22 = vcombine.high %v5895_v26, %v3414_v45  ;;  %v3473_v59 = vrot.slane %v3219_v55, %v5868_v57 }
 0x2d3   : > { %v1436_v60 = vcombine.low %v1427_v42, %v1435_v51  ;;  %v1437_v62 = vcombine.high %v1427_v42, %v1435_v51  ;;  %v3423_v61 = vrot.slane %v3415_v52, %v5871_v29  ;;  %v3430_v37 = vrot.slane %v3416_v15, %v5871_v29 }
 0x2d4   : > { %v1485_v2 = vrot.slane %v1478_v56, %v5871_v29  ;;  %v3439_v18 = vrot.slane %v3431_v54, %v5871_v29  ;;  %v3446_v3 = vrot.slane %v3432_v22, %v5871_v29  ;;  %v3480_v4 = vrot.slane %v3466_v21, %v5868_v57 }
 0x2d5   : > { %v1791_v6 = vshrl.u32 %v1436_v60, 16  ;;  %v1797_v7 = vshrl.u32 %v1437_v62, 16  ;;  %v3481_v26 = vcombine.low %v5898_v27, %v3473_v59  ;;  %v3482_v55 = vcombine.high %v5898_v27, %v3473_v59 }
 0x2d6   : > { %v1486_v8 = vcombine.low %v1477_v46, %v1485_v2  ;;  %v1487_v9 = vcombine.high %v1477_v46, %v1485_v2  ;;  %v3497_v10 = vcombine.low %v5901_v28, %v3480_v4  ;;  %v3498_v12 = vcombine.high %v5901_v28, %v3480_v4  ;;  %v1978_v4 = vpop.permute.xlu0 %1977 }
 0x2d7   : > { %v3489_v17 = vrot.slane %v3481_v26, %v5871_v29  ;;  %v3496_v19 = vrot.slane %v3482_v55, %v5871_v29  ;;  %v3881_v23 = vcombine.low %v3423_v61, %v3430_v37  ;;  %v5180_v24 = vcombine.high %v3423_v61, %v3430_v37 }
 0x2d8   : > { %v1790_v13 = vpack.i.b16 %v1486_v8, %v1436_v60  ;;  %v1792_v33 = vshrl.u32 %v1486_v8, 16  ;;  %v1796_v34 = vpack.i.b16 %v1487_v9, %v1437_v62  ;;  %v1798_v39 = vshrl.u32 %v1487_v9, 16 }
 0x2d9   : > { %v3505_v27 = vrot.slane %v3497_v10, %v5871_v29  ;;  %v3512_v42 = vrot.slane %v3498_v12, %v5871_v29  ;;  %v3888_v44 = vrot.slane %v3881_v23, %v5868_v57  ;;  %v3896_v14 = vrot.slane %v5180_v24, %v5868_v57 }
 0x2da   : > { %v1793_v28 = vpack.i.b16 %v1792_v33, %v1791_v6  ;;  %v1799_v45 = vpack.i.b16 %v1798_v39, %v1797_v7  ;;  %v5096_v47 = vcombine.low %v1790_v13, %v1790_v13  ;;  %v5097_v49 = vcombine.high %v1790_v13, %v1790_v13 }
 0x2db   : > { %v5112_v50 = vcombine.low %v1796_v34, %v1796_v34  ;;  %v5113_v21 = vcombine.high %v1796_v34, %v1796_v34  ;;  %v3897_v51 = vcombine.low %v3439_v18, %v3446_v3  ;;  %v5181_v52 = vcombine.high %v3439_v18, %v3446_v3  ;;  %v769_v3 = vpop.permute.xlu1 %768 }
 0x2dc   : > { %v5104_v15 = vcombine.low %v1793_v28, %v1793_v28  ;;  %v5105_v54 = vcombine.high %v1793_v28, %v1793_v28  ;;  %v5120_v46 = vcombine.low %v1799_v45, %v1799_v45  ;;  %v5121_v56 = vcombine.high %v1799_v45, %v1799_v45  ;;  %1933 = vst.msk [vmem:[%s5961_s7] sm:$0xf] %vm1932_vm0, %v5096_v47  ;;  %v1986_v45 = vpop.permute.xlu0 %1985 }
 0x2dd   : > { %1934 = vst.msk [vmem:[%s5961_s7 + $0x4] sm:$0xf] %vm1932_vm0, %v5097_v49  ;;  %1949 = vst.msk [vmem:[%s5961_s7 + $0x40] sm:$0xf] %vm1932_vm0, %v5112_v50  ;;  %v3904_v22 = vrot.slane %v3897_v51, %v5868_v57  ;;  %v3912_v59 = vrot.slane %v5181_v52, %v5868_v57  ;;  %v3913_v60 = vcombine.low %v3888_v44, %v3896_v14  ;;  %v1998_v18 = vshrl.u32 %v5903_v36, 16 }
 0x2de   : > { %1950 = vst.msk [vmem:[%s5961_s7 + $0x44] sm:$0xf] %vm1932_vm0, %v5113_v21  ;;  %v3931_v62 = vcombine.low %v3489_v17, %v3496_v19  ;;  %1941 = vst.msk [vmem:[%s5961_s7 + $0x20] sm:$0xf] %vm1932_vm0, %v5104_v15  ;;  %v5182_v61 = vcombine.high %v3489_v17, %v3496_v19  ;;  %v3947_v37 = vcombine.low %v3505_v27, %v3512_v42  ;;  %v2029_v55 = vshrl.u32 %v5834_v40, 16 }
 0x2df   : > { %1942 = vst.msk [vmem:[%s5961_s7 + $0x24] sm:$0xf] %vm1932_vm0, %v5105_v54  ;;  %1957 = vst.msk [vmem:[%s5961_s7 + $0x60] sm:$0xf] %vm1932_vm0, %v5120_v46  ;;  %v5183_v2 = vcombine.high %v3505_v27, %v3512_v42  ;;  %v3921_v6 = vcombine.low %v3904_v22, %v3912_v59  ;;  %v2057_v26 = vcombine.high %v5910_v48, %v5865_v53  ;;  %v777_v28 = vpop.permute.xlu1 %776  ;;  %v2005_v54 = vshrl.u32 %v1978_v4, 16 }
 0x2e0   : > { %1958 = vst.msk [vmem:[%s5961_s7 + $0x64] sm:$0xf] %vm1932_vm0, %v5121_v56  ;;  %v3938_v7 = vrot.slane %v3931_v62, %v5868_v57  ;;  %v3946_v8 = vrot.slane %v5182_v61, %v5868_v57  ;;  %v3954_v9 = vrot.slane %v3947_v37, %v5868_v57  ;;  %v1999_v12 = vpack.i.b16 %v1998_v18, %v1997_v58 }
 0x2e1   : > { %v3962_v10 = vrot.slane %v5183_v2, %v5868_v57  ;;  %v3920_v36 = vrot.slane %v3913_v60, %v5871_v29  ;;  %v3928_v17 = vrot.slane %v3921_v6, %v5871_v29  ;;  %v5995_v19 = vrot.slane %v5910_v48, %v5868_v57 }
 0x2e2   : > { %v814_v23 = vpack.i.b16 %v769_v3, %v5786_v16  ;;  %v3963_v24 = vcombine.low %v3938_v7, %v3946_v8  ;;  %v5999_v33 = vrot.slane %v2057_v26, %v5868_v57  ;;  %v2123_v34 = vcombine.high %v1999_v12, %v5865_v53 }
 0x2e3   : > { %v3971_v13 = vcombine.low %v3954_v9, %v3962_v10  ;;  %v3929_v39 = vcombine.low %v3920_v36, %v3928_v17  ;;  %v3930_v11 = vcombine.high %v3920_v36, %v3928_v17  ;;  %v817_v58 = vshrl.u32 %v769_v3, 16 }
 0x2e4   : > { %v992_v27 = vcombine.high %v814_v23, %v5865_v53  ;;  %v3970_v42 = vrot.slane %v3963_v24, %v5871_v29  ;;  %v6006_v48 = vrot.slane %v1999_v12, %v5868_v57  ;;  %v6009_v14 = vrot.slane %v2123_v34, %v5868_v57  ;;  %v785_v12 = vpop.permute.xlu1 %784 }
 0x2e5   : > { %v3978_v44 = vrot.slane %v3971_v13, %v5871_v29  ;;  %v4196_v47 = vshrl.u32 %v3929_v39, 16  ;;  %v4202_v49 = vshrl.u32 %v3930_v11, 16  ;;  %v818_v50 = vpack.i.b16 %v817_v58, %v816_v63 }
 0x2e6   : > { %v6014_v21 = vrot.slane %v814_v23, %v5868_v57  ;;  %v6017_v15 = vrot.slane %v992_v27, %v5868_v57  ;;  %v824_v56 = vshrl.u32 %v777_v28, 16  ;;  %v2003_v22 = vpack.i.b16 %v1986_v45, %v1978_v4 }
 0x2e7   : > { %v3979_v51 = vcombine.low %v3970_v42, %v3978_v44  ;;  %v3980_v52 = vcombine.high %v3970_v42, %v3978_v44  ;;  %v1058_v46 = vcombine.high %v818_v50, %v5865_v53  ;;  %v2006_v59 = vshrl.u32 %v1986_v45, 16 }
 0x2e8   : > { %v6021_v16 = vrot.slane %v818_v50, %v5868_v57  ;;  %v2072_v2 = vcombine.high %v2003_v22, %v5865_v53  ;;  %v2079_v18 = vrot.slane %v2003_v22, %v5868_v57  ;;  %v825_v42 = vshrl.u32 %v785_v12, 16 }
 0x2e9   : > { %v4195_v60 = vpack.i.b16 %v3979_v51, %v3929_v39  ;;  %v4197_v62 = vshrl.u32 %v3979_v51, 16  ;;  %v4201_v61 = vpack.i.b16 %v3980_v52, %v3930_v11  ;;  %v4203_v37 = vshrl.u32 %v3980_v52, 16 }
 0x2ea   : > { %v2007_v63 = vpack.i.b16 %v2006_v59, %v2005_v54  ;;  %v2086_v9 = vrot.slane %v2072_v2, %v5868_v57  ;;  %v2087_v10 = vcombine.low %v5995_v19, %v2079_v18  ;;  %v2088_v13 = vcombine.high %v5995_v19, %v2079_v18 }
 0x2eb   : > { %v4198_v3 = vpack.i.b16 %v4197_v62, %v4196_v47  ;;  %v4204_v6 = vpack.i.b16 %v4203_v37, %v4202_v49  ;;  %v5194_v7 = vcombine.low %v4195_v60, %v4195_v60  ;;  %v5195_v26 = vcombine.high %v4195_v60, %v4195_v60 }
 0x2ec   : > { %v5210_v8 = vcombine.low %v4201_v61, %v4201_v61  ;;  %v5211_v4 = vcombine.high %v4201_v61, %v4201_v61  ;;  %v2095_v34 = vrot.slane %v2087_v10, %v5871_v29  ;;  %v2103_v39 = vcombine.low %v5999_v33, %v2086_v9 }
 0x2ed   : > { %v5202_v36 = vcombine.low %v4198_v3, %v4198_v3  ;;  %v5203_v17 = vcombine.high %v4198_v3, %v4198_v3  ;;  %v5218_v23 = vcombine.low %v4204_v6, %v4204_v6  ;;  %v5219_v24 = vcombine.high %v4204_v6, %v4204_v6  ;;  %4327 = vst.msk [vmem:[%s6028_s20 + $0x8] sm:$0xf] %vm1932_vm0, %v5194_v7 }
 0x2ee   : > { %4328 = vst.msk [vmem:[%s6028_s20 + $0xc] sm:$0xf] %vm1932_vm0, %v5195_v26  ;;  %4343 = vst.msk [vmem:[%s6028_s20 + $0x48] sm:$0xf] %vm1932_vm0, %v5210_v8  ;;  %v2104_v11 = vcombine.high %v5999_v33, %v2086_v9  ;;  %v6051_v58 = vrot.slane %v1058_v46, %v5868_v57  ;;  %v2138_v27 = vcombine.high %v2007_v63, %v5865_v53 }
 0x2ef   : > { %4344 = vst.msk [vmem:[%s6028_s20 + $0x4c] sm:$0xf] %vm1932_vm0, %v5211_v4  ;;  %4335 = vst.msk [vmem:[%s6028_s20 + $0x28] sm:$0xf] %vm1932_vm0, %v5202_v36  ;;  %v2145_v19 = vrot.slane %v2007_v63, %v5868_v57  ;;  %v2102_v44 = vrot.slane %v2088_v13, %v5871_v29  ;;  %v2111_v33 = vrot.slane %v2103_v39, %v5871_v29  ;;  %v6079_v13 = vpop.permute.xlu0 %3165 }
 0x2f0   : > { %4336 = vst.msk [vmem:[%s6028_s20 + $0x2c] sm:$0xf] %vm1932_vm0, %v5203_v17  ;;  %4351 = vst.msk [vmem:[%s6028_s20 + $0x68] sm:$0xf] %vm1932_vm0, %v5218_v23  ;;  %v2118_v45 = vrot.slane %v2104_v11, %v5871_v29  ;;  %v822_v47 = vpack.i.b16 %v785_v12, %v777_v28  ;;  %v2152_v49 = vrot.slane %v2138_v27, %v5868_v57 }
 0x2f1   : > { %4352 = vst.msk [vmem:[%s6028_s20 + $0x6c] sm:$0xf] %vm1932_vm0, %v5219_v24  ;;  %v2153_v50 = vcombine.low %v6006_v48, %v2145_v19  ;;  %v2154_v51 = vcombine.high %v6006_v48, %v2145_v19  ;;  %v826_v52 = vpack.i.b16 %v825_v42, %v824_v56  ;;  %v2585_v54 = vcombine.low %v2095_v34, %v2102_v44 }
 0x2f2   : > { %v5128_v46 = vcombine.high %v2095_v34, %v2102_v44  ;;  %v2601_v22 = vcombine.low %v2111_v33, %v2118_v45  ;;  %v5129_v59 = vcombine.high %v2111_v33, %v2118_v45  ;;  %v2169_v61 = vcombine.low %v6009_v14, %v2152_v49 }
 0x2f3   : > { %v2161_v60 = vrot.slane %v2153_v50, %v5871_v29  ;;  %v2168_v62 = vrot.slane %v2154_v51, %v5871_v29  ;;  %v2170_v37 = vcombine.high %v6009_v14, %v2152_v49  ;;  %v2592_v28 = vrot.slane %v2585_v54, %v5868_v57 }
 0x2f4   : > { %v2600_v63 = vrot.slane %v5128_v46, %v5868_v57  ;;  %v2608_v2 = vrot.slane %v2601_v22, %v5868_v57  ;;  %v2616_v48 = vrot.slane %v5129_v59, %v5868_v57  ;;  %v2177_v56 = vrot.slane %v2169_v61, %v5871_v29 }
 0x2f5   : > { %v2184_v18 = vrot.slane %v2170_v37, %v5871_v29  ;;  %v2635_v3 = vcombine.low %v2161_v60, %v2168_v62  ;;  %v5130_v6 = vcombine.high %v2161_v60, %v2168_v62  ;;  %v1007_v8 = vcombine.high %v822_v47, %v5865_v53 }
 0x2f6   : > { %v2617_v7 = vcombine.low %v2592_v28, %v2600_v63  ;;  %v2625_v26 = vcombine.low %v2608_v2, %v2616_v48  ;;  %v1014_v14 = vrot.slane %v822_v47, %v5868_v57  ;;  %v6090_v50 = vpack.i.b16 %v6079_v13, %v5796_v20 }
 0x2f7   : > { %v2642_v4 = vrot.slane %v2635_v3, %v5868_v57  ;;  %v2650_v9 = vrot.slane %v5130_v6, %v5868_v57  ;;  %v2651_v10 = vcombine.low %v2177_v56, %v2184_v18  ;;  %v5131_v12 = vcombine.high %v2177_v56, %v2184_v18 }
 0x2f8   : > { %v2624_v36 = vrot.slane %v2617_v7, %v5871_v29  ;;  %v2632_v17 = vrot.slane %v2625_v26, %v5871_v29  ;;  %v1021_v23 = vrot.slane %v1007_v8, %v5868_v57  ;;  %v1022_v24 = vcombine.low %v6014_v21, %v1014_v14 }
 0x2f9   : > { %v2658_v34 = vrot.slane %v2651_v10, %v5868_v57  ;;  %v2666_v39 = vrot.slane %v5131_v12, %v5868_v57  ;;  %v2667_v11 = vcombine.low %v2642_v4, %v2650_v9  ;;  %v1023_v27 = vcombine.high %v6014_v21, %v1014_v14  ;;  %v3172_v4 = vpop.permute.xlu1 %3171 }
 0x2fa   : > { %v2633_v19 = vcombine.low %v2624_v36, %v2632_v17  ;;  %v2634_v42 = vcombine.high %v2624_v36, %v2632_v17  ;;  %v1030_v44 = vrot.slane %v1022_v24, %v5871_v29  ;;  %v1038_v33 = vcombine.low %v6017_v15, %v1021_v23 }
 0x2fb   : > { %v2675_v45 = vcombine.low %v2658_v34, %v2666_v39  ;;  %v1037_v47 = vrot.slane %v1023_v27, %v5871_v29  ;;  %v1039_v49 = vcombine.high %v6017_v15, %v1021_v23  ;;  %v2674_v51 = vrot.slane %v2667_v11, %v5871_v29 }
 0x2fc   : > { %v2988_v54 = vshrl.u32 %v2633_v19, 16  ;;  %v2994_v46 = vshrl.u32 %v2634_v42, 16  ;;  %v1073_v21 = vcombine.high %v826_v52, %v5865_v53  ;;  %v1046_v59 = vrot.slane %v1038_v33, %v5871_v29 }
 0x2fd   : > { %v2682_v22 = vrot.slane %v2675_v45, %v5871_v29  ;;  %v1080_v60 = vrot.slane %v826_v52, %v5868_v57  ;;  %v1488_v62 = vcombine.low %v1030_v44, %v1037_v47  ;;  %v1053_v61 = vrot.slane %v1039_v49, %v5871_v29 }
 0x2fe   : > { %v1087_v15 = vrot.slane %v1073_v21, %v5868_v57  ;;  %v5084_v37 = vcombine.high %v1030_v44, %v1037_v47  ;;  %v3194_v28 = vshrl.u32 %v6079_v13, 16  ;;  %v3174_v21 = vpop.permute.xlu0 %3173  ;;  %v2045_v20 = vshrl.u32 %v5850_v43, 16 }
 0x2ff   : > { %v2683_v63 = vcombine.low %v2674_v51, %v2682_v22  ;;  %v2684_v2 = vcombine.high %v2674_v51, %v2682_v22  ;;  %v1088_v48 = vcombine.low %v6021_v16, %v1080_v60  ;;  %v1089_v56 = vcombine.high %v6021_v16, %v1080_v60  ;;  %v6133_v22 = vpop.permute.xlu1 %3179 }
 0x300   : > { %v1104_v18 = vcombine.low %v6051_v58, %v1087_v15  ;;  %v1105_v3 = vcombine.high %v6051_v58, %v1087_v15  ;;  %v1495_v52 = vrot.slane %v1488_v62, %v5868_v57  ;;  %v1503_v6 = vrot.slane %v5084_v37, %v5868_v57 }
 0x301   : > { %v2987_v7 = vpack.i.b16 %v2683_v63, %v2633_v19  ;;  %v2989_v26 = vshrl.u32 %v2683_v63, 16  ;;  %v2993_v8 = vpack.i.b16 %v2684_v2, %v2634_v42  ;;  %v2995_v14 = vshrl.u32 %v2684_v2, 16 }
 0x302   : > { %v1096_v9 = vrot.slane %v1088_v48, %v5871_v29  ;;  %v1103_v10 = vrot.slane %v1089_v56, %v5871_v29  ;;  %v1112_v16 = vrot.slane %v1104_v18, %v5871_v29  ;;  %v1119_v12 = vrot.slane %v1105_v3, %v5871_v29 }
 0x303   : > { %v2990_v36 = vpack.i.b16 %v2989_v26, %v2988_v54  ;;  %v2996_v58 = vpack.i.b16 %v2995_v14, %v2994_v46  ;;  %v5144_v17 = vcombine.low %v2987_v7, %v2987_v7  ;;  %v5145_v23 = vcombine.high %v2987_v7, %v2987_v7 }
 0x304   : > { %v5160_v24 = vcombine.low %v2993_v8, %v2993_v8  ;;  %v5161_v13 = vcombine.high %v2993_v8, %v2993_v8  ;;  %v1504_v34 = vcombine.low %v1046_v59, %v1053_v61  ;;  %v5085_v39 = vcombine.high %v1046_v59, %v1053_v61 }
 0x305   : > { %v5152_v11 = vcombine.low %v2990_v36, %v2990_v36  ;;  %v5153_v27 = vcombine.high %v2990_v36, %v2990_v36  ;;  %v5168_v19 = vcombine.low %v2996_v58, %v2996_v58  ;;  %v5169_v42 = vcombine.high %v2996_v58, %v2996_v58  ;;  %3129 = vst.msk [vmem:[%s6111_s11] sm:$0xf] %vm1932_vm0, %v5144_v17 }
 0x306   : > { %3130 = vst.msk [vmem:[%s6111_s11 + $0x4] sm:$0xf] %vm1932_vm0, %v5145_v23  ;;  %3145 = vst.msk [vmem:[%s6111_s11 + $0x40] sm:$0xf] %vm1932_vm0, %v5160_v24  ;;  %v1511_v44 = vrot.slane %v1504_v34, %v5868_v57  ;;  %v1519_v33 = vrot.slane %v5085_v39, %v5868_v57  ;;  %v1520_v45 = vcombine.low %v1495_v52, %v1503_v6  ;;  %v848_v61 = vshrl.u32 %v5836_v41, 16 }
 0x307   : > { %3146 = vst.msk [vmem:[%s6111_s11 + $0x44] sm:$0xf] %vm1932_vm0, %v5161_v13  ;;  %v1538_v47 = vcombine.low %v1096_v9, %v1103_v10  ;;  %3137 = vst.msk [vmem:[%s6111_s11 + $0x20] sm:$0xf] %vm1932_vm0, %v5152_v11  ;;  %v5086_v49 = vcombine.high %v1096_v9, %v1103_v10  ;;  %v1554_v51 = vcombine.low %v1112_v16, %v1119_v12  ;;  %v3242_v52 = vshrl.u32 %v3172_v4, 16 }
 0x308   : > { %3138 = vst.msk [vmem:[%s6111_s11 + $0x24] sm:$0xf] %vm1932_vm0, %v5153_v27  ;;  %3153 = vst.msk [vmem:[%s6111_s11 + $0x60] sm:$0xf] %vm1932_vm0, %v5168_v19  ;;  %v5087_v54 = vcombine.high %v1112_v16, %v1119_v12  ;;  %v3195_v46 = vpack.i.b16 %v3194_v28, %v3193_v0  ;;  %v1528_v59 = vcombine.low %v1511_v44, %v1519_v33  ;;  %v3201_v16 = vshrl.u32 %v3174_v21, 16  ;;  %v3182_v12 = vpop.permute.xlu0 %3181 }
 0x309   : > { %3154 = vst.msk [vmem:[%s6111_s11 + $0x64] sm:$0xf] %vm1932_vm0, %v5169_v42  ;;  %v1545_v60 = vrot.slane %v1538_v47, %v5868_v57  ;;  %v3253_v62 = vcombine.high %v6090_v50, %v5865_v53  ;;  %v1553_v15 = vrot.slane %v5086_v49, %v5868_v57  ;;  %v1561_v37 = vrot.slane %v1554_v51, %v5868_v57 }
 0x30a   : > { %v1569_v63 = vrot.slane %v5087_v54, %v5868_v57  ;;  %v1527_v0 = vrot.slane %v1520_v45, %v5871_v29  ;;  %v1535_v28 = vrot.slane %v1528_v59, %v5871_v29  ;;  %v3319_v2 = vcombine.high %v3195_v46, %v5865_v53 }
 0x30b   : > { %v6147_v48 = vpack.i.b16 %v3172_v4, %v5802_v25  ;;  %v1570_v56 = vcombine.low %v1545_v60, %v1553_v15  ;;  %v6151_v3 = vrot.slane %v6090_v50, %v5868_v57  ;;  %v3267_v26 = vrot.slane %v3253_v62, %v5868_v57  ;;  %v1972_v50 = vpop.permute.xlu1 %1971 }
 0x30c   : > { %v1578_v18 = vcombine.low %v1561_v37, %v1569_v63  ;;  %v1536_v6 = vcombine.low %v1527_v0, %v1535_v28  ;;  %v1537_v7 = vcombine.high %v1527_v0, %v1535_v28  ;;  %v6155_v8 = vrot.slane %v3195_v46, %v5868_v57 }
 0x30d   : > { %v1577_v14 = vrot.slane %v1570_v56, %v5871_v29  ;;  %v6161_v10 = vpack.i.b16 %v3242_v52, %v3241_v30  ;;  %v6164_v4 = vrot.slane %v3319_v2, %v5868_v57  ;;  %v3649_v58 = vcombine.high %v6147_v48, %v5865_v53 }
 0x30e   : > { %v1585_v9 = vrot.slane %v1578_v18, %v5871_v29  ;;  %v1803_v36 = vshrl.u32 %v1536_v6, 16  ;;  %v6170_v17 = vrot.slane %v6147_v48, %v5868_v57  ;;  %v1809_v13 = vshrl.u32 %v1537_v7, 16 }
 0x30f   : > { %v3249_v25 = vshrl.u32 %v6133_v22, 16  ;;  %v3715_v30 = vcombine.high %v6161_v10, %v5865_v53  ;;  %v3199_v34 = vpack.i.b16 %v3182_v12, %v3174_v21  ;;  %v3202_v39 = vshrl.u32 %v3182_v12, 16 }
 0x310   : > { %v1586_v23 = vcombine.low %v1577_v14, %v1585_v9  ;;  %v1587_v24 = vcombine.high %v1577_v14, %v1585_v9  ;;  %v2011_v11 = vpack.i.b16 %v1972_v50, %v5812_v31  ;;  %v2014_v49 = vshrl.u32 %v1972_v50, 16  ;;  %v3170_v9 = vpop.permute.xlu0 %3169 }
 0x311   : > { %v3203_v33 = vpack.i.b16 %v3202_v39, %v3201_v16  ;;  %v3268_v45 = vcombine.high %v3199_v34, %v5865_v53  ;;  %v3275_v47 = vrot.slane %v3199_v34, %v5868_v57  ;;  %v6203_v16 = vpop.permute.xlu1 %1979  ;;  %v3729_v48 = vrot.slane %v3715_v30, %v5868_v57 }
 0x312   : > { %v1802_v27 = vpack.i.b16 %v1586_v23, %v1536_v6  ;;  %v1804_v19 = vshrl.u32 %v1586_v23, 16  ;;  %v1808_v42 = vpack.i.b16 %v1587_v24, %v1537_v7  ;;  %v1810_v44 = vshrl.u32 %v1587_v24, 16 }
 0x313   : > { %v3282_v62 = vrot.slane %v3268_v45, %v5868_v57  ;;  %v3283_v15 = vcombine.low %v6151_v3, %v3275_v47  ;;  %v3284_v2 = vcombine.high %v6151_v3, %v3275_v47  ;;  %v3334_v6 = vcombine.high %v3203_v33, %v5865_v53 }
 0x314   : > { %v1805_v51 = vpack.i.b16 %v1804_v19, %v1803_v36  ;;  %v1811_v54 = vpack.i.b16 %v1810_v44, %v1809_v13  ;;  %v5098_v46 = vcombine.low %v1802_v27, %v1802_v27  ;;  %v5099_v21 = vcombine.high %v1802_v27, %v1802_v27 }
 0x315   : > { %v5114_v59 = vcombine.low %v1808_v42, %v1808_v42  ;;  %v5115_v60 = vcombine.high %v1808_v42, %v1808_v42  ;;  %v3291_v56 = vrot.slane %v3283_v15, %v5871_v29  ;;  %v3299_v18 = vcombine.low %v3267_v26, %v3282_v62 }
 0x316   : > { %v5106_v37 = vcombine.low %v1805_v51, %v1805_v51  ;;  %v5107_v63 = vcombine.high %v1805_v51, %v1805_v51  ;;  %v5122_v0 = vcombine.low %v1811_v54, %v1811_v54  ;;  %v5123_v28 = vcombine.high %v1811_v54, %v1811_v54  ;;  %1935 = vst.msk [vmem:[%s5961_s7 + $0x8] sm:$0xf] %vm1932_vm0, %v5098_v46 }
 0x317   : > { %1936 = vst.msk [vmem:[%s5961_s7 + $0xc] sm:$0xf] %vm1932_vm0, %v5099_v21  ;;  %1951 = vst.msk [vmem:[%s5961_s7 + $0x48] sm:$0xf] %vm1932_vm0, %v5114_v59  ;;  %v3300_v52 = vcombine.high %v3267_v26, %v3282_v62  ;;  %v3341_v7 = vrot.slane %v3203_v33, %v5868_v57  ;;  %v2015_v14 = vpack.i.b16 %v2014_v49, %v2013_v1  ;;  %v6227_v21 = vpop.permute.xlu0 %3177  ;;  %v1988_v59 = vpop.permute.xlu1 %1987 }
 0x318   : > { %1952 = vst.msk [vmem:[%s5961_s7 + $0x4c] sm:$0xf] %vm1932_vm0, %v5115_v60  ;;  %1943 = vst.msk [vmem:[%s5961_s7 + $0x28] sm:$0xf] %vm1932_vm0, %v5106_v37  ;;  %v2189_v3 = vcombine.high %v2011_v11, %v5865_v53  ;;  %v3298_v26 = vrot.slane %v3284_v2, %v5871_v29  ;;  %v3307_v12 = vrot.slane %v3299_v18, %v5871_v29 }
 0x319   : > { %1944 = vst.msk [vmem:[%s5961_s7 + $0x2c] sm:$0xf] %vm1932_vm0, %v5107_v63  ;;  %1959 = vst.msk [vmem:[%s5961_s7 + $0x68] sm:$0xf] %vm1932_vm0, %v5122_v0  ;;  %v3314_v50 = vrot.slane %v3300_v52, %v5871_v29  ;;  %v6209_v36 = vrot.slane %v2011_v11, %v5868_v57  ;;  %v3348_v23 = vrot.slane %v3334_v6, %v5868_v57 }
 0x31a   : > { %1960 = vst.msk [vmem:[%s5961_s7 + $0x6c] sm:$0xf] %vm1932_vm0, %v5123_v28  ;;  %v3349_v24 = vcombine.low %v6155_v8, %v3341_v7  ;;  %v3350_v31 = vcombine.high %v6155_v8, %v3341_v7  ;;  %v6215_v1 = vrot.slane %v2189_v3, %v5868_v57  ;;  %v3781_v13 = vcombine.low %v3291_v56, %v3298_v26 }
 0x31b   : > { %v5176_v34 = vcombine.high %v3291_v56, %v3298_v26  ;;  %v3797_v39 = vcombine.low %v3307_v12, %v3314_v50  ;;  %v5177_v27 = vcombine.high %v3307_v12, %v3314_v50  ;;  %v3365_v11 = vcombine.low %v6164_v4, %v3348_v23 }
 0x31c   : > { %v3357_v19 = vrot.slane %v3349_v24, %v5871_v29  ;;  %v3364_v42 = vrot.slane %v3350_v31, %v5871_v29  ;;  %v3366_v44 = vcombine.high %v6164_v4, %v3348_v23  ;;  %v3788_v33 = vrot.slane %v3781_v13, %v5868_v57 }
 0x31d   : > { %v3796_v45 = vrot.slane %v5176_v34, %v5868_v57  ;;  %v3804_v8 = vrot.slane %v3797_v39, %v5868_v57  ;;  %v3812_v47 = vrot.slane %v5177_v27, %v5868_v57  ;;  %v3373_v49 = vrot.slane %v3365_v11, %v5871_v29  ;;  %v6251_v39 = vpop.permute.xlu0 %778  ;;  %v771_v27 = vpop.permute.xlu1 %770 }
 0x31e   : > { %v3380_v51 = vrot.slane %v3366_v44, %v5871_v29  ;;  %v3831_v54 = vcombine.low %v3357_v19, %v3364_v42  ;;  %v5178_v46 = vcombine.high %v3357_v19, %v3364_v42  ;;  %v2255_v4 = vcombine.high %v2015_v14, %v5865_v53 }
 0x31f   : > { %v3813_v60 = vcombine.low %v3788_v33, %v3796_v45  ;;  %v3821_v62 = vcombine.low %v3804_v8, %v3812_v47  ;;  %v6231_v15 = vrot.slane %v2015_v14, %v5868_v57  ;;  %v3223_v52 = vpack.i.b16 %v3170_v9, %v5814_v32 }
 0x320   : > { %v3838_v37 = vrot.slane %v3831_v54, %v5868_v57  ;;  %v3846_v63 = vrot.slane %v5178_v46, %v5868_v57  ;;  %v3847_v0 = vcombine.low %v3373_v49, %v3380_v51  ;;  %v5179_v28 = vcombine.high %v3373_v49, %v3380_v51 }
 0x321   : > { %v3820_v2 = vrot.slane %v3813_v60, %v5871_v29  ;;  %v3828_v56 = vrot.slane %v3821_v62, %v5871_v29  ;;  %v6238_v18 = vrot.slane %v2255_v4, %v5868_v57  ;;  %v3226_v3 = vshrl.u32 %v3170_v9, 16 }
 0x322   : > { %v3854_v6 = vrot.slane %v3847_v0, %v5868_v57  ;;  %v3862_v7 = vrot.slane %v5179_v28, %v5868_v57  ;;  %v3863_v14 = vcombine.low %v3838_v37, %v3846_v63  ;;  %v3517_v50 = vcombine.high %v3223_v52, %v5865_v53 }
 0x323   : > { %v3829_v26 = vcombine.low %v3820_v2, %v3828_v56  ;;  %v3830_v12 = vcombine.high %v3820_v2, %v3828_v56  ;;  %v6245_v23 = vrot.slane %v3223_v52, %v5868_v57  ;;  %v3227_v13 = vpack.i.b16 %v3226_v3, %v3225_v38 }
 0x324   : > { %v3870_v24 = vrot.slane %v3863_v14, %v5871_v29  ;;  %v3871_v31 = vcombine.low %v3854_v6, %v3862_v7  ;;  %v2021_v34 = vshrl.u32 %v6203_v16, 16  ;;  %v6254_v42 = vrot.slane %v3517_v50, %v5868_v57 }
 0x325   : > { %v4184_v19 = vshrl.u32 %v3829_v26, 16  ;;  %v4190_v9 = vshrl.u32 %v3830_v12, 16  ;;  %v3233_v11 = vshrl.u32 %v6227_v21, 16  ;;  %v3583_v33 = vcombine.high %v3227_v13, %v5865_v53 }
 0x326   : > { %v3878_v44 = vrot.slane %v3871_v31, %v5871_v29  ;;  %v6260_v45 = vrot.slane %v3227_v13, %v5868_v57  ;;  %v2019_v32 = vpack.i.b16 %v1988_v59, %v6203_v16  ;;  %v2022_v38 = vshrl.u32 %v1988_v59, 16 }
 0x327   : > { %v840_v8 = vshrl.u32 %v6251_v39, 16  ;;  %v830_v47 = vpack.i.b16 %v771_v27, %v5824_v35  ;;  %v833_v49 = vshrl.u32 %v771_v27, 16  ;;  %v6266_v46 = vrot.slane %v3583_v33, %v5868_v57 }
 0x328   : > { %v3879_v51 = vcombine.low %v3870_v24, %v3878_v44  ;;  %v3880_v54 = vcombine.high %v3870_v24, %v3878_v44  ;;  %v2204_v60 = vcombine.high %v2019_v32, %v5865_v53  ;;  %v2023_v62 = vpack.i.b16 %v2022_v38, %v2021_v34 }
 0x329   : > { %v2211_v4 = vrot.slane %v2019_v32, %v5868_v57  ;;  %v6272_v37 = vpack.i.b16 %v833_v49, %v832_v5  ;;  %v1124_v16 = vcombine.high %v830_v47, %v5865_v53  ;;  %v1131_v32 = vrot.slane %v830_v47, %v5868_v57 }
 0x32a   : > { %v4183_v59 = vpack.i.b16 %v3879_v51, %v3829_v26  ;;  %v4185_v63 = vshrl.u32 %v3879_v51, 16  ;;  %v4189_v0 = vpack.i.b16 %v3880_v54, %v3830_v12  ;;  %v4191_v28 = vshrl.u32 %v3880_v54, 16 }
 0x32b   : > { %v2218_v2 = vrot.slane %v2204_v60, %v5868_v57  ;;  %v2219_v56 = vcombine.low %v6209_v36, %v2211_v4  ;;  %v2220_v52 = vcombine.high %v6209_v36, %v2211_v4  ;;  %v2270_v6 = vcombine.high %v2023_v62, %v5865_v53 }
 0x32c   : > { %v4186_v35 = vpack.i.b16 %v4185_v63, %v4184_v19  ;;  %v4192_v5 = vpack.i.b16 %v4191_v28, %v4190_v9  ;;  %v5192_v7 = vcombine.low %v4183_v59, %v4183_v59  ;;  %v5193_v14 = vcombine.high %v4183_v59, %v4183_v59 }
 0x32d   : > { %v5208_v3 = vcombine.low %v4189_v0, %v4189_v0  ;;  %v5209_v26 = vcombine.high %v4189_v0, %v4189_v0  ;;  %v2227_v12 = vrot.slane %v2219_v56, %v5871_v29  ;;  %v2234_v50 = vrot.slane %v2220_v52, %v5871_v29 }
 0x32e   : > { %v5200_v24 = vcombine.low %v4186_v35, %v4186_v35  ;;  %v5201_v36 = vcombine.high %v4186_v35, %v4186_v35  ;;  %v5216_v31 = vcombine.low %v4192_v5, %v4192_v5  ;;  %v5217_v13 = vcombine.high %v4192_v5, %v4192_v5  ;;  %4325 = vst.msk [vmem:[%s6028_s20] sm:$0xf] %vm1932_vm0, %v5192_v7  ;;  %v787_v5 = vpop.permute.xlu0 %786 }
 0x32f   : > { %4326 = vst.msk [vmem:[%s6028_s20 + $0x4] sm:$0xf] %vm1932_vm0, %v5193_v14  ;;  %4341 = vst.msk [vmem:[%s6028_s20 + $0x40] sm:$0xf] %vm1932_vm0, %v5208_v3  ;;  %v2235_v34 = vcombine.low %v6215_v1, %v2218_v2  ;;  %v2236_v27 = vcombine.high %v6215_v1, %v2218_v2  ;;  %v2277_v19 = vrot.slane %v2023_v62, %v5868_v57 }
 0x330   : > { %4342 = vst.msk [vmem:[%s6028_s20 + $0x44] sm:$0xf] %vm1932_vm0, %v5209_v26  ;;  %v2284_v9 = vrot.slane %v2270_v6, %v5868_v57  ;;  %4333 = vst.msk [vmem:[%s6028_s20 + $0x20] sm:$0xf] %vm1932_vm0, %v5200_v24  ;;  %v2685_v44 = vcombine.low %v2227_v12, %v2234_v50  ;;  %v5132_v33 = vcombine.high %v2227_v12, %v2234_v50  ;;  %v773_v12 = vpop.permute.xlu1 %772 }
 0x331   : > { %4334 = vst.msk [vmem:[%s6028_s20 + $0x24] sm:$0xf] %vm1932_vm0, %v5201_v36  ;;  %4349 = vst.msk [vmem:[%s6028_s20 + $0x60] sm:$0xf] %vm1932_vm0, %v5216_v31  ;;  %v6303_v38 = vrot.slane %v1124_v16, %v5868_v57  ;;  %v2243_v1 = vrot.slane %v2235_v34, %v5871_v29  ;;  %v2250_v49 = vrot.slane %v2236_v27, %v5871_v29 }
 0x332   : > { %4350 = vst.msk [vmem:[%s6028_s20 + $0x64] sm:$0xf] %vm1932_vm0, %v5217_v13  ;;  %v2285_v51 = vcombine.low %v6231_v15, %v2277_v19  ;;  %v2286_v54 = vcombine.high %v6231_v15, %v2277_v19  ;;  %v2301_v60 = vcombine.low %v6238_v18, %v2284_v9  ;;  %v2302_v62 = vcombine.high %v6238_v18, %v2284_v9 }
 0x333   : > { %v2692_v4 = vrot.slane %v2685_v44, %v5868_v57  ;;  %v2700_v59 = vrot.slane %v5132_v33, %v5868_v57  ;;  %v2701_v63 = vcombine.low %v2243_v1, %v2250_v49  ;;  %v5133_v0 = vcombine.high %v2243_v1, %v2250_v49 }
 0x334   : > { %v2293_v47 = vrot.slane %v2285_v51, %v5871_v29  ;;  %v2300_v16 = vrot.slane %v2286_v54, %v5871_v29  ;;  %v2309_v28 = vrot.slane %v2301_v60, %v5871_v29  ;;  %v2316_v2 = vrot.slane %v2302_v62, %v5871_v29 }
 0x335   : > { %v2717_v56 = vcombine.low %v2692_v4, %v2700_v59  ;;  %v1190_v15 = vcombine.high %v6272_v37, %v5865_v53  ;;  %v2708_v18 = vrot.slane %v2701_v63, %v5868_v57  ;;  %v2716_v52 = vrot.slane %v5133_v0, %v5868_v57 }
 0x336   : > { %v2735_v6 = vcombine.low %v2293_v47, %v2300_v16  ;;  %v5134_v35 = vcombine.high %v2293_v47, %v2300_v16  ;;  %v2751_v14 = vcombine.low %v2309_v28, %v2316_v2  ;;  %v5135_v3 = vcombine.high %v2309_v28, %v2316_v2 }
 0x337   : > { %v2724_v7 = vrot.slane %v2717_v56, %v5871_v29  ;;  %v1197_v26 = vrot.slane %v6272_v37, %v5868_v57  ;;  %v2725_v50 = vcombine.low %v2708_v18, %v2716_v52  ;;  %v6327_v31 = vrot.slane %v1190_v15, %v5868_v57 }
 0x338   : > { %v2742_v24 = vrot.slane %v2735_v6, %v5868_v57  ;;  %v2750_v36 = vrot.slane %v5134_v35, %v5868_v57  ;;  %v2758_v13 = vrot.slane %v2751_v14, %v5868_v57  ;;  %v2766_v34 = vrot.slane %v5135_v3, %v5868_v57 }
 0x339   : > { %v838_v27 = vpack.i.b16 %v787_v5, %v6251_v39  ;;  %v841_v19 = vshrl.u32 %v787_v5, 16  ;;  %v2732_v9 = vrot.slane %v2725_v50, %v5871_v29  ;;  %v6334_v37 = vpack.i.b16 %v773_v12, %v5836_v41 }
 0x33a   : > { %v2767_v44 = vcombine.low %v2742_v24, %v2750_v36  ;;  %v849_v33 = vshrl.u32 %v773_v12, 16  ;;  %v2775_v1 = vcombine.low %v2758_v13, %v2766_v34  ;;  %v6357_v36 = vpop.permute.xlu0 %1973 }
 0x33b   : > { %v842_v49 = vpack.i.b16 %v841_v19, %v840_v8  ;;  %v1139_v51 = vcombine.high %v838_v27, %v5865_v53  ;;  %v1146_v54 = vrot.slane %v838_v27, %v5868_v57  ;;  %v2733_v60 = vcombine.low %v2724_v7, %v2732_v9 }
 0x33c   : > { %v2734_v62 = vcombine.high %v2724_v7, %v2732_v9  ;;  %v2774_v4 = vrot.slane %v2767_v44, %v5871_v29  ;;  %v6343_v59 = vpack.i.b16 %v849_v33, %v848_v61  ;;  %v2782_v47 = vrot.slane %v2775_v1, %v5871_v29 }
 0x33d   : > { %v1153_v16 = vrot.slane %v1139_v51, %v5868_v57  ;;  %v1154_v63 = vcombine.low %v1131_v32, %v1146_v54  ;;  %v1155_v0 = vcombine.high %v1131_v32, %v1146_v54  ;;  %v3000_v39 = vshrl.u32 %v2733_v60, 16 }
 0x33e   : > { %v3006_v8 = vshrl.u32 %v2734_v62, 16  ;;  %v1205_v28 = vcombine.high %v842_v49, %v5865_v53  ;;  %v1212_v2 = vrot.slane %v842_v49, %v5868_v57  ;;  %v2783_v56 = vcombine.low %v2774_v4, %v2782_v47 }
 0x33f   : > { %v2784_v15 = vcombine.high %v2774_v4, %v2782_v47  ;;  %v1162_v18 = vrot.slane %v1154_v63, %v5871_v29  ;;  %v1169_v41 = vrot.slane %v1155_v0, %v5871_v29  ;;  %v1170_v61 = vcombine.low %v6303_v38, %v1153_v16 }
 0x340   : > { %v1171_v52 = vcombine.high %v6303_v38, %v1153_v16  ;;  %v1219_v6 = vrot.slane %v1205_v28, %v5868_v57  ;;  %v1220_v35 = vcombine.low %v1197_v26, %v1212_v2  ;;  %v2999_v32 = vpack.i.b16 %v2783_v56, %v2733_v60 }
 0x341   : > { %v3001_v5 = vshrl.u32 %v2783_v56, 16  ;;  %v3005_v7 = vpack.i.b16 %v2784_v15, %v2734_v62  ;;  %v3007_v14 = vshrl.u32 %v2784_v15, 16  ;;  %v1178_v3 = vrot.slane %v1170_v61, %v5871_v29  ;;  %v6384_v56 = vpop.permute.xlu0 %1981 }
 0x342   : > { %v1185_v12 = vrot.slane %v1171_v52, %v5871_v29  ;;  %v1221_v50 = vcombine.high %v1197_v26, %v1212_v2  ;;  %v1228_v24 = vrot.slane %v1220_v35, %v5871_v29  ;;  %v5146_v34 = vcombine.low %v2999_v32, %v2999_v32 }
 0x343   : > { %v3002_v38 = vpack.i.b16 %v3001_v5, %v3000_v39  ;;  %v3008_v13 = vpack.i.b16 %v3007_v14, %v3006_v8  ;;  %v5147_v27 = vcombine.high %v2999_v32, %v2999_v32  ;;  %v5162_v19 = vcombine.low %v3005_v7, %v3005_v7  ;;  %v781_v39 = vpop.permute.xlu1 %780 }
 0x344   : > { %v5163_v9 = vcombine.high %v3005_v7, %v3005_v7  ;;  %v1235_v44 = vrot.slane %v1221_v50, %v5871_v29  ;;  %v1236_v26 = vcombine.low %v6327_v31, %v1219_v6  ;;  %3131 = vst.msk [vmem:[%s6111_s11 + $0x8] sm:$0xf] %vm1932_vm0, %v5146_v34  ;;  %v1237_v54 = vcombine.high %v6327_v31, %v1219_v6 }
 0x345   : > { %v5154_v33 = vcombine.low %v3002_v38, %v3002_v38  ;;  %v5155_v1 = vcombine.high %v3002_v38, %v3002_v38  ;;  %v5170_v49 = vcombine.low %v3008_v13, %v3008_v13  ;;  %v5171_v51 = vcombine.high %v3008_v13, %v3008_v13  ;;  %3132 = vst.msk [vmem:[%s6111_s11 + $0xc] sm:$0xf] %vm1932_vm0, %v5147_v27 }
 0x346   : > { %3147 = vst.msk [vmem:[%s6111_s11 + $0x48] sm:$0xf] %vm1932_vm0, %v5162_v19  ;;  %3148 = vst.msk [vmem:[%s6111_s11 + $0x4c] sm:$0xf] %vm1932_vm0, %v5163_v9  ;;  %v1244_v60 = vrot.slane %v1236_v26, %v5871_v29  ;;  %v1588_v62 = vcombine.low %v1162_v18, %v1169_v41  ;;  %v5088_v4 = vcombine.high %v1162_v18, %v1169_v41  ;;  %v856_v26 = vshrl.u32 %v781_v39, 16 }
 0x347   : > { %3139 = vst.msk [vmem:[%s6111_s11 + $0x28] sm:$0xf] %vm1932_vm0, %v5154_v33  ;;  %3140 = vst.msk [vmem:[%s6111_s11 + $0x2c] sm:$0xf] %vm1932_vm0, %v5155_v1  ;;  %v1604_v47 = vcombine.low %v1178_v3, %v1185_v12  ;;  %v5089_v16 = vcombine.high %v1178_v3, %v1185_v12  ;;  %v1638_v63 = vcombine.low %v1228_v24, %v1235_v44  ;;  %v789_v19 = vpop.permute.xlu1 %788  ;;  %v2037_v33 = vshrl.u32 %v6384_v56, 16  ;;  %v1990_v1 = vpop.permute.xlu0 %1989 }
 0x348   : > { %3155 = vst.msk [vmem:[%s6111_s11 + $0x68] sm:$0xf] %vm1932_vm0, %v5170_v49  ;;  %3156 = vst.msk [vmem:[%s6111_s11 + $0x6c] sm:$0xf] %vm1932_vm0, %v5171_v51  ;;  %v5090_v0 = vcombine.high %v1228_v24, %v1235_v44  ;;  %v1251_v8 = vrot.slane %v1237_v54, %v5871_v29  ;;  %v1595_v31 = vrot.slane %v1588_v62, %v5868_v57  ;;  %v2030_v44 = vshrl.u32 %v6357_v36, 16 }
 0x349   : > { %v1603_v28 = vrot.slane %v5088_v4, %v5868_v57  ;;  %v1256_v2 = vcombine.high %v6334_v37, %v5865_v53  ;;  %v1611_v15 = vrot.slane %v1604_v47, %v5868_v57  ;;  %v1619_v18 = vrot.slane %v5089_v16, %v5868_v57 }
 0x34a   : > { %v1645_v41 = vrot.slane %v1638_v63, %v5868_v57  ;;  %v1653_v61 = vrot.slane %v5090_v0, %v5868_v57  ;;  %v1654_v6 = vcombine.low %v1244_v60, %v1251_v8  ;;  %v5091_v35 = vcombine.high %v1244_v60, %v1251_v8 }
 0x34b   : > { %v1620_v52 = vcombine.low %v1595_v31, %v1603_v28  ;;  %v1263_v32 = vrot.slane %v6334_v37, %v5868_v57  ;;  %v1628_v5 = vcombine.low %v1611_v15, %v1619_v18  ;;  %v6393_v14 = vrot.slane %v1256_v2, %v5868_v57 }
 0x34c   : > { %v1670_v7 = vcombine.low %v1645_v41, %v1653_v61  ;;  %v1322_v3 = vcombine.high %v6343_v59, %v5865_v53  ;;  %v1661_v50 = vrot.slane %v1654_v6, %v5868_v57  ;;  %v1669_v24 = vrot.slane %v5091_v35, %v5868_v57 }
 0x34d   : > { %v1627_v12 = vrot.slane %v1620_v52, %v5871_v29  ;;  %v6402_v38 = vrot.slane %v6343_v59, %v5868_v57  ;;  %v1635_v37 = vrot.slane %v1628_v5, %v5871_v29  ;;  %v2027_v27 = vpack.i.b16 %v6357_v36, %v5834_v40 }
 0x34e   : > { %v1677_v13 = vrot.slane %v1670_v7, %v5871_v29  ;;  %v6407_v34 = vrot.slane %v1322_v3, %v5868_v57  ;;  %v1678_v9 = vcombine.low %v1661_v50, %v1669_v24  ;;  %v2031_v62 = vpack.i.b16 %v2030_v44, %v2029_v55 }
 0x34f   : > { %v1636_v59 = vcombine.low %v1627_v12, %v1635_v37  ;;  %v1637_v49 = vcombine.high %v1627_v12, %v1635_v37  ;;  %v2321_v51 = vcombine.high %v2027_v27, %v5865_v53  ;;  %v6415_v54 = vrot.slane %v2027_v27, %v5868_v57 }
 0x350   : > { %v1685_v60 = vrot.slane %v1678_v9, %v5871_v29  ;;  %v854_v4 = vpack.i.b16 %v789_v19, %v781_v39  ;;  %v857_v47 = vshrl.u32 %v789_v19, 16  ;;  %v2035_v0 = vpack.i.b16 %v1990_v1, %v6384_v56 }
 0x351   : > { %v1815_v16 = vshrl.u32 %v1636_v59, 16  ;;  %v1821_v36 = vshrl.u32 %v1637_v49, 16  ;;  %v6421_v63 = vrot.slane %v2321_v51, %v5868_v57  ;;  %v2387_v28 = vcombine.high %v2031_v62, %v5865_v53 }
 0x352   : > { %v1686_v8 = vcombine.low %v1677_v13, %v1685_v60  ;;  %v1687_v31 = vcombine.high %v1677_v13, %v1685_v60  ;;  %v6426_v2 = vrot.slane %v2031_v62, %v5868_v57  ;;  %v858_v15 = vpack.i.b16 %v857_v47, %v856_v26 }
 0x353   : > { %v1271_v40 = vcombine.high %v854_v4, %v5865_v53  ;;  %v1278_v55 = vrot.slane %v854_v4, %v5868_v57  ;;  %v2038_v39 = vshrl.u32 %v1990_v1, 16  ;;  %v6431_v6 = vrot.slane %v2387_v28, %v5868_v57 }
 0x354   : > { %v1814_v18 = vpack.i.b16 %v1686_v8, %v1636_v59  ;;  %v1816_v41 = vshrl.u32 %v1686_v8, 16  ;;  %v1820_v61 = vpack.i.b16 %v1687_v31, %v1637_v49  ;;  %v1822_v52 = vshrl.u32 %v1687_v31, 16 }
 0x355   : > { %v1285_v56 = vrot.slane %v1271_v40, %v5868_v57  ;;  %v1286_v35 = vcombine.low %v1263_v32, %v1278_v55  ;;  %v1287_v5 = vcombine.high %v1263_v32, %v1278_v55  ;;  %v1337_v59 = vcombine.high %v858_v15, %v5865_v53 }
 0x356   : > { %v1817_v7 = vpack.i.b16 %v1816_v41, %v1815_v16  ;;  %v1823_v3 = vpack.i.b16 %v1822_v52, %v1821_v36  ;;  %v5100_v12 = vcombine.low %v1814_v18, %v1814_v18  ;;  %v5101_v50 = vcombine.high %v1814_v18, %v1814_v18 }
 0x357   : > { %v5116_v24 = vcombine.low %v1820_v61, %v1820_v61  ;;  %v5117_v37 = vcombine.high %v1820_v61, %v1820_v61  ;;  %v1294_v13 = vrot.slane %v1286_v35, %v5871_v29  ;;  %v1301_v27 = vrot.slane %v1287_v5, %v5871_v29 }
 0x358   : > { %v5108_v19 = vcombine.low %v1817_v7, %v1817_v7  ;;  %v5109_v9 = vcombine.high %v1817_v7, %v1817_v7  ;;  %v5124_v44 = vcombine.low %v1823_v3, %v1823_v3  ;;  %v5125_v26 = vcombine.high %v1823_v3, %v1823_v3  ;;  %1937 = vst.msk [vmem:[%s5961_s7 + $0x10] sm:$0xf] %vm1932_vm0, %v5100_v12 }
 0x359   : > { %1938 = vst.msk [vmem:[%s5961_s7 + $0x14] sm:$0xf] %vm1932_vm0, %v5101_v50  ;;  %1953 = vst.msk [vmem:[%s5961_s7 + $0x50] sm:$0xf] %vm1932_vm0, %v5116_v24  ;;  %v1302_v32 = vcombine.low %v6393_v14, %v1285_v56  ;;  %v1303_v1 = vcombine.high %v6393_v14, %v1285_v56  ;;  %v1344_v49 = vrot.slane %v858_v15, %v5868_v57 }
 0x35a   : > { %1954 = vst.msk [vmem:[%s5961_s7 + $0x54] sm:$0xf] %vm1932_vm0, %v5117_v37  ;;  %1945 = vst.msk [vmem:[%s5961_s7 + $0x30] sm:$0xf] %vm1932_vm0, %v5108_v19  ;;  %v1688_v51 = vcombine.low %v1294_v13, %v1301_v27  ;;  %v5092_v60 = vcombine.high %v1294_v13, %v1301_v27  ;;  %v2039_v62 = vpack.i.b16 %v2038_v39, %v2037_v33 }
 0x35b   : > { %1946 = vst.msk [vmem:[%s5961_s7 + $0x34] sm:$0xf] %vm1932_vm0, %v5109_v9  ;;  %1961 = vst.msk [vmem:[%s5961_s7 + $0x70] sm:$0xf] %vm1932_vm0, %v5124_v44  ;;  %v2336_v4 = vcombine.high %v2035_v0, %v5865_v53  ;;  %v1310_v47 = vrot.slane %v1302_v32, %v5871_v29  ;;  %v1317_v14 = vrot.slane %v1303_v1, %v5871_v29 }
 0x35c   : > { %1962 = vst.msk [vmem:[%s5961_s7 + $0x74] sm:$0xf] %vm1932_vm0, %v5125_v26  ;;  %v1351_v16 = vrot.slane %v1337_v59, %v5868_v57  ;;  %v1352_v36 = vcombine.low %v6402_v38, %v1344_v49  ;;  %v1353_v8 = vcombine.high %v6402_v38, %v1344_v49  ;;  %v1695_v31 = vrot.slane %v1688_v51, %v5868_v57 }
 0x35d   : > { %v1703_v28 = vrot.slane %v5092_v60, %v5868_v57  ;;  %v2343_v15 = vrot.slane %v2035_v0, %v5868_v57  ;;  %v1704_v39 = vcombine.low %v1310_v47, %v1317_v14  ;;  %v5093_v41 = vcombine.high %v1310_v47, %v1317_v14 }
 0x35e   : > { %v1360_v33 = vrot.slane %v1352_v36, %v5871_v29  ;;  %v1368_v40 = vcombine.low %v6407_v34, %v1351_v16  ;;  %v1369_v55 = vcombine.high %v6407_v34, %v1351_v16  ;;  %v1367_v18 = vrot.slane %v1353_v8, %v5871_v29 }
 0x35f   : > { %v1720_v61 = vcombine.low %v1695_v31, %v1703_v28  ;;  %v2350_v52 = vrot.slane %v2336_v4, %v5868_v57  ;;  %v1711_v35 = vrot.slane %v1704_v39, %v5868_v57  ;;  %v2351_v0 = vcombine.low %v6415_v54, %v2343_v15 }
 0x360   : > { %v1376_v38 = vrot.slane %v1368_v40, %v5871_v29  ;;  %v1383_v56 = vrot.slane %v1369_v55, %v5871_v29  ;;  %v1719_v5 = vrot.slane %v5093_v41, %v5868_v57  ;;  %v1738_v34 = vcombine.low %v1360_v33, %v1367_v18 }
 0x361   : > { %v1727_v7 = vrot.slane %v1720_v61, %v5871_v29  ;;  %v5094_v3 = vcombine.high %v1360_v33, %v1367_v18  ;;  %v2352_v24 = vcombine.high %v6415_v54, %v2343_v15  ;;  %v2359_v37 = vrot.slane %v2351_v0, %v5871_v29 }
 0x362   : > { %v1754_v12 = vcombine.low %v1376_v38, %v1383_v56  ;;  %v5095_v50 = vcombine.high %v1376_v38, %v1383_v56  ;;  %v1728_v13 = vcombine.low %v1711_v35, %v1719_v5  ;;  %v1745_v27 = vrot.slane %v1738_v34, %v5868_v57  ;;  %v1976_v38 = vpop.permute.xlu1 %1975 }
 0x363   : > { %v1753_v19 = vrot.slane %v5094_v3, %v5868_v57  ;;  %v2367_v9 = vcombine.low %v6421_v63, %v2350_v52  ;;  %v2366_v32 = vrot.slane %v2352_v24, %v5871_v29  ;;  %v2368_v1 = vcombine.high %v6421_v63, %v2350_v52 }
 0x364   : > { %v1761_v44 = vrot.slane %v1754_v12, %v5868_v57  ;;  %v1769_v26 = vrot.slane %v5095_v50, %v5868_v57  ;;  %v1735_v59 = vrot.slane %v1728_v13, %v5871_v29  ;;  %v2402_v51 = vcombine.high %v2039_v62, %v5865_v53 }
 0x365   : > { %v1770_v54 = vcombine.low %v1745_v27, %v1753_v19  ;;  %v2375_v49 = vrot.slane %v2367_v9, %v5871_v29  ;;  %v2382_v4 = vrot.slane %v2368_v1, %v5871_v29  ;;  %v2409_v47 = vrot.slane %v2039_v62, %v5868_v57 }
 0x366   : > { %v1778_v60 = vcombine.low %v1761_v44, %v1769_v26  ;;  %v2785_v14 = vcombine.low %v2359_v37, %v2366_v32  ;;  %v1736_v16 = vcombine.low %v1727_v7, %v1735_v59  ;;  %v1737_v36 = vcombine.high %v1727_v7, %v1735_v59 }
 0x367   : > { %v1777_v8 = vrot.slane %v1770_v54, %v5871_v29  ;;  %v2416_v31 = vrot.slane %v2402_v51, %v5868_v57  ;;  %v2417_v28 = vcombine.low %v6426_v2, %v2409_v47  ;;  %v2418_v15 = vcombine.high %v6426_v2, %v2409_v47  ;;  %v3186_v51 = vpop.permute.xlu0 %3185 }
 0x368   : > { %v1785_v63 = vrot.slane %v1778_v60, %v5871_v29  ;;  %v2792_v33 = vrot.slane %v2785_v14, %v5868_v57  ;;  %v1827_v40 = vshrl.u32 %v1736_v16, 16  ;;  %v1833_v55 = vshrl.u32 %v1737_v36, 16  ;;  %v6509_v60 = vpop.permute.xlu1 %1983 }
 0x369   : > { %v2433_v39 = vcombine.low %v6431_v6, %v2416_v31  ;;  %v2434_v62 = vcombine.high %v6431_v6, %v2416_v31  ;;  %v2425_v61 = vrot.slane %v2417_v28, %v5871_v29  ;;  %v2432_v52 = vrot.slane %v2418_v15, %v5871_v29 }
 0x36a   : > { %v1786_v18 = vcombine.low %v1777_v8, %v1785_v63  ;;  %v1787_v41 = vcombine.high %v1777_v8, %v1785_v63  ;;  %v5136_v2 = vcombine.high %v2359_v37, %v2366_v32  ;;  %v2801_v0 = vcombine.low %v2375_v49, %v2382_v4 }
 0x36b   : > { %v2441_v56 = vrot.slane %v2433_v39, %v5871_v29  ;;  %v2448_v35 = vrot.slane %v2434_v62, %v5871_v29  ;;  %v5137_v50 = vcombine.high %v2375_v49, %v2382_v4  ;;  %v2835_v24 = vcombine.low %v2425_v61, %v2432_v52 }
 0x36c   : > { %v1826_v5 = vpack.i.b16 %v1786_v18, %v1736_v16  ;;  %v1828_v7 = vshrl.u32 %v1786_v18, 16  ;;  %v1832_v34 = vpack.i.b16 %v1787_v41, %v1737_v36  ;;  %v1834_v3 = vshrl.u32 %v1787_v41, 16 }
 0x36d   : > { %v2800_v12 = vrot.slane %v5136_v2, %v5868_v57  ;;  %v2808_v6 = vrot.slane %v2801_v0, %v5868_v57  ;;  %v2816_v26 = vrot.slane %v5137_v50, %v5868_v57  ;;  %v2842_v14 = vrot.slane %v2835_v24, %v5868_v57 }
 0x36e   : > { %v1829_v13 = vpack.i.b16 %v1828_v7, %v1827_v40  ;;  %v1835_v27 = vpack.i.b16 %v1834_v3, %v1833_v55  ;;  %v5102_v19 = vcombine.low %v1826_v5, %v1826_v5  ;;  %v5103_v9 = vcombine.high %v1826_v5, %v1826_v5  ;;  %v6544_v5 = vpop.permute.xlu1 %1991 }
 0x36f   : > { %v5118_v37 = vcombine.low %v1832_v34, %v1832_v34  ;;  %v5119_v44 = vcombine.high %v1832_v34, %v1832_v34  ;;  %v2817_v32 = vcombine.low %v2792_v33, %v2800_v12  ;;  %v2825_v47 = vcombine.low %v2808_v6, %v2816_v26 }
 0x370   : > { %v5110_v1 = vcombine.low %v1829_v13, %v1829_v13  ;;  %v5111_v59 = vcombine.high %v1829_v13, %v1829_v13  ;;  %v5126_v54 = vcombine.low %v1835_v27, %v1835_v27  ;;  %v5127_v49 = vcombine.high %v1835_v27, %v1835_v27  ;;  %1939 = vst.msk [vmem:[%s5961_s7 + $0x18] sm:$0xf] %vm1932_vm0, %v5102_v19 }
 0x371   : > { %1940 = vst.msk [vmem:[%s5961_s7 + $0x1c] sm:$0xf] %vm1932_vm0, %v5103_v9  ;;  %1955 = vst.msk [vmem:[%s5961_s7 + $0x58] sm:$0xf] %vm1932_vm0, %v5118_v37  ;;  %v2824_v4 = vrot.slane %v2817_v32, %v5871_v29  ;;  %v5138_v16 = vcombine.high %v2425_v61, %v2432_v52  ;;  %v2851_v36 = vcombine.low %v2441_v56, %v2448_v35  ;;  %v2046_v63 = vshrl.u32 %v1976_v38, 16 }
 0x372   : > { %1956 = vst.msk [vmem:[%s5961_s7 + $0x5c] sm:$0xf] %vm1932_vm0, %v5119_v44  ;;  %1947 = vst.msk [vmem:[%s5961_s7 + $0x38] sm:$0xf] %vm1932_vm0, %v5110_v1  ;;  %v5139_v8 = vcombine.high %v2441_v56, %v2448_v35  ;;  %v2043_v31 = vpack.i.b16 %v1976_v38, %v5850_v43  ;;  %v2832_v28 = vrot.slane %v2825_v47, %v5871_v29  ;;  %v3234_v40 = vshrl.u32 %v3186_v51, 16 }
 0x373   : > { %1948 = vst.msk [vmem:[%s5961_s7 + $0x3c] sm:$0xf] %vm1932_vm0, %v5111_v59  ;;  %1963 = vst.msk [vmem:[%s5961_s7 + $0x78] sm:$0xf] %vm1932_vm0, %v5126_v54  ;;  %v2850_v15 = vrot.slane %v5138_v16, %v5868_v57  ;;  %v3231_v33 = vpack.i.b16 %v3186_v51, %v6227_v21  ;;  %v2858_v55 = vrot.slane %v2851_v36, %v5868_v57  ;;  %v2053_v27 = vshrl.u32 %v6509_v60, 16 }
 0x374   : > { %1964 = vst.msk [vmem:[%s5961_s7 + $0x7c] sm:$0xf] %vm1932_vm0, %v5127_v49  ;;  %v2866_v39 = vrot.slane %v5139_v8, %v5868_v57  ;;  %v2047_v62 = vpack.i.b16 %v2046_v63, %v2045_v20  ;;  %v2453_v18 = vcombine.high %v2043_v31, %v5865_v53  ;;  %v2833_v41 = vcombine.low %v2824_v4, %v2832_v28 }
 0x375   : > { %v2834_v61 = vcombine.high %v2824_v4, %v2832_v28  ;;  %v2867_v52 = vcombine.low %v2842_v14, %v2850_v15  ;;  %v6535_v38 = vrot.slane %v2043_v31, %v5868_v57  ;;  %v3235_v34 = vpack.i.b16 %v3234_v40, %v3233_v11 }
 0x376   : > { %v2875_v56 = vcombine.low %v2858_v55, %v2866_v39  ;;  %v6538_v35 = vrot.slane %v2453_v18, %v5868_v57  ;;  %v2519_v2 = vcombine.high %v2047_v62, %v5865_v53  ;;  %v6542_v0 = vrot.slane %v2047_v62, %v5868_v57 }
 0x377   : > { %v2874_v43 = vrot.slane %v2867_v52, %v5871_v29  ;;  %v3012_v20 = vshrl.u32 %v2833_v41, 16  ;;  %v3018_v7 = vshrl.u32 %v2834_v61, 16  ;;  %v3532_v6 = vcombine.high %v3231_v33, %v5865_v53 }
 0x378   : > { %v2882_v3 = vrot.slane %v2875_v56, %v5871_v29  ;;  %v6551_v12 = vrot.slane %v2519_v2, %v5868_v57  ;;  %v3539_v50 = vrot.slane %v3231_v33, %v5868_v57  ;;  %v3598_v24 = vcombine.high %v3235_v34, %v5865_v53 }
 0x379   : > { %v3605_v13 = vrot.slane %v3235_v34, %v5868_v57  ;;  %v6560_v19 = vpack.i.b16 %v6544_v5, %v6509_v60  ;;  %v3546_v9 = vrot.slane %v3532_v6, %v5868_v57 }
 0x37a   : > { %v2883_v21 = vcombine.low %v2874_v43, %v2882_v3  ;;  %v2884_v11 = vcombine.high %v2874_v43, %v2882_v3  ;;  %v3547_v37 = vcombine.low %v6245_v23, %v3539_v50  ;;  %v3548_v44 = vcombine.high %v6245_v23, %v3539_v50 }
 0x37b   : > { %v3612_v26 = vrot.slane %v3598_v24, %v5868_v57  ;;  %v3613_v32 = vcombine.low %v6260_v45, %v3605_v13  ;;  %v3614_v1 = vcombine.high %v6260_v45, %v3605_v13  ;;  %v3563_v14 = vcombine.low %v6254_v42, %v3546_v9 }
 0x37c   : > { %v3011_v59 = vpack.i.b16 %v2883_v21, %v2833_v41  ;;  %v3013_v54 = vshrl.u32 %v2883_v21, 16  ;;  %v3017_v49 = vpack.i.b16 %v2884_v11, %v2834_v61  ;;  %v3019_v51 = vshrl.u32 %v2884_v11, 16 }
 0x37d   : > { %v3555_v4 = vrot.slane %v3547_v37, %v5871_v29  ;;  %v3562_v47 = vrot.slane %v3548_v44, %v5871_v29  ;;  %v3564_v23 = vcombine.high %v6254_v42, %v3546_v9  ;;  %v3571_v28 = vrot.slane %v3563_v14, %v5871_v29 }
 0x37e   : > { %v3014_v16 = vpack.i.b16 %v3013_v54, %v3012_v20  ;;  %v3020_v36 = vpack.i.b16 %v3019_v51, %v3018_v7  ;;  %v5148_v8 = vcombine.low %v3011_v59, %v3011_v59  ;;  %v5149_v45 = vcombine.high %v3011_v59, %v3011_v59 }
 0x37f   : > { %v5164_v31 = vcombine.low %v3017_v49, %v3017_v49  ;;  %v5165_v63 = vcombine.high %v3017_v49, %v3017_v49  ;;  %v3578_v15 = vrot.slane %v3564_v23, %v5871_v29  ;;  %v3621_v42 = vrot.slane %v3613_v32, %v5871_v29 }
 0x380   : > { %v5156_v33 = vcombine.low %v3014_v16, %v3014_v16  ;;  %v5157_v40 = vcombine.high %v3014_v16, %v3014_v16  ;;  %v5172_v55 = vcombine.low %v3020_v36, %v3020_v36  ;;  %v5173_v39 = vcombine.high %v3020_v36, %v3020_v36  ;;  %3133 = vst.msk [vmem:[%s6111_s11 + $0x10] sm:$0xf] %vm1932_vm0, %v5148_v8 }
 0x381   : > { %3134 = vst.msk [vmem:[%s6111_s11 + $0x14] sm:$0xf] %vm1932_vm0, %v5149_v45  ;;  %3149 = vst.msk [vmem:[%s6111_s11 + $0x50] sm:$0xf] %vm1932_vm0, %v5164_v31  ;;  %v3628_v62 = vrot.slane %v3614_v1, %v5871_v29  ;;  %v3629_v18 = vcombine.low %v6266_v46, %v3612_v26  ;;  %v3630_v41 = vcombine.high %v6266_v46, %v3612_v26  ;;  %v2054_v44 = vshrl.u32 %v6544_v5, 16 }
 0x382   : > { %3150 = vst.msk [vmem:[%s6111_s11 + $0x54] sm:$0xf] %vm1932_vm0, %v5165_v63  ;;  %3141 = vst.msk [vmem:[%s6111_s11 + $0x30] sm:$0xf] %vm1932_vm0, %v5156_v33  ;;  %v3981_v61 = vcombine.low %v3555_v4, %v3562_v47  ;;  %v5184_v52 = vcombine.high %v3555_v4, %v3562_v47  ;;  %v3997_v56 = vcombine.low %v3571_v28, %v3578_v15 }
 0x383   : > { %3142 = vst.msk [vmem:[%s6111_s11 + $0x34] sm:$0xf] %vm1932_vm0, %v5157_v40  ;;  %3157 = vst.msk [vmem:[%s6111_s11 + $0x70] sm:$0xf] %vm1932_vm0, %v5172_v55  ;;  %v5185_v2 = vcombine.high %v3571_v28, %v3578_v15  ;;  %v3637_v43 = vrot.slane %v3629_v18, %v5871_v29  ;;  %v3644_v20 = vrot.slane %v3630_v41, %v5871_v29 }
 0x384   : > { %3158 = vst.msk [vmem:[%s6111_s11 + $0x74] sm:$0xf] %vm1932_vm0, %v5173_v39  ;;  %v4031_v7 = vcombine.low %v3621_v42, %v3628_v62  ;;  %v5186_v34 = vcombine.high %v3621_v42, %v3628_v62  ;;  %v3988_v46 = vrot.slane %v3981_v61, %v5868_v57  ;;  %v3996_v3 = vrot.slane %v5184_v52, %v5868_v57 }
 0x385   : > { %v4004_v6 = vrot.slane %v3997_v56, %v5868_v57  ;;  %v4012_v50 = vrot.slane %v5185_v2, %v5868_v57  ;;  %v4047_v21 = vcombine.low %v3637_v43, %v3644_v20  ;;  %v5187_v11 = vcombine.high %v3637_v43, %v3644_v20 }
 0x386   : > { %v4038_v24 = vrot.slane %v4031_v7, %v5868_v57  ;;  %v4046_v13 = vrot.slane %v5186_v34, %v5868_v57  ;;  %v4013_v9 = vcombine.low %v3988_v46, %v3996_v3  ;;  %v2468_v26 = vcombine.high %v6560_v19, %v5865_v53 }
 0x387   : > { %v4021_v37 = vcombine.low %v4004_v6, %v4012_v50  ;;  %v4054_v32 = vrot.slane %v4047_v21, %v5868_v57  ;;  %v4062_v1 = vrot.slane %v5187_v11, %v5868_v57  ;;  %v2475_v54 = vrot.slane %v6560_v19, %v5868_v57 }
 0x388   : > { %v4063_v59 = vcombine.low %v4038_v24, %v4046_v13  ;;  %v4020_v49 = vrot.slane %v4013_v9, %v5871_v29  ;;  %v2055_v4 = vpack.i.b16 %v2054_v44, %v2053_v27  ;;  %v2482_v5 = vrot.slane %v2468_v26, %v5868_v57  ;;  %v3188_v44 = vpop.permute.xlu1 %3187 }
 0x389   : > { %v4028_v51 = vrot.slane %v4021_v37, %v5871_v29  ;;  %v4071_v14 = vcombine.low %v4054_v32, %v4062_v1  ;;  %v2483_v23 = vcombine.low %v6535_v38, %v2475_v54  ;;  %v2484_v16 = vcombine.high %v6535_v38, %v2475_v54 }
 0x38a   : > { %v4070_v47 = vrot.slane %v4063_v59, %v5871_v29  ;;  %v2499_v19 = vcombine.low %v6538_v35, %v2482_v5  ;;  %v2500_v45 = vcombine.high %v6538_v35, %v2482_v5  ;;  %v2534_v63 = vcombine.high %v2055_v4, %v5865_v53 }
 0x38b   : > { %v4029_v36 = vcombine.low %v4020_v49, %v4028_v51  ;;  %v4030_v8 = vcombine.high %v4020_v49, %v4028_v51  ;;  %v4078_v31 = vrot.slane %v4071_v14, %v5871_v29  ;;  %v2491_v60 = vrot.slane %v2483_v23, %v5871_v29 }
 0x38c   : > { %v2498_v27 = vrot.slane %v2484_v16, %v5871_v29  ;;  %v2507_v33 = vrot.slane %v2499_v19, %v5871_v29  ;;  %v2514_v38 = vrot.slane %v2500_v45, %v5871_v29  ;;  %v2541_v39 = vrot.slane %v2055_v4, %v5868_v57 }
 0x38d   : > { %v4208_v28 = vshrl.u32 %v4029_v36, 16  ;;  %v4214_v15 = vshrl.u32 %v4030_v8, 16  ;;  %v4079_v40 = vcombine.low %v4070_v47, %v4078_v31  ;;  %v4080_v55 = vcombine.high %v4070_v47, %v4078_v31 }
 0x38e   : > { %v2548_v35 = vrot.slane %v2534_v63, %v5868_v57  ;;  %v2885_v42 = vcombine.low %v2491_v60, %v2498_v27  ;;  %v5140_v62 = vcombine.high %v2491_v60, %v2498_v27  ;;  %v2901_v18 = vcombine.low %v2507_v33, %v2514_v38 }
 0x38f   : > { %v5141_v41 = vcombine.high %v2507_v33, %v2514_v38  ;;  %v4207_v61 = vpack.i.b16 %v4079_v40, %v4029_v36  ;;  %v4209_v52 = vshrl.u32 %v4079_v40, 16  ;;  %v4213_v56 = vpack.i.b16 %v4080_v55, %v4030_v8 }
 0x390   : > { %v4215_v2 = vshrl.u32 %v4080_v55, 16  ;;  %v2549_v43 = vcombine.low %v6542_v0, %v2541_v39  ;;  %v2550_v20 = vcombine.high %v6542_v0, %v2541_v39  ;;  %v2565_v7 = vcombine.low %v6551_v12, %v2548_v35 }
 0x391   : > { %v2566_v34 = vcombine.high %v6551_v12, %v2548_v35  ;;  %v4210_v46 = vpack.i.b16 %v4209_v52, %v4208_v28  ;;  %v5196_v6 = vcombine.low %v4207_v61, %v4207_v61  ;;  %v5197_v50 = vcombine.high %v4207_v61, %v4207_v61 }
 0x392   : > { %v4216_v3 = vpack.i.b16 %v4215_v2, %v4214_v15  ;;  %v5212_v24 = vcombine.low %v4213_v56, %v4213_v56  ;;  %v5213_v13 = vcombine.high %v4213_v56, %v4213_v56  ;;  %v2557_v21 = vrot.slane %v2549_v43, %v5871_v29 }
 0x393   : > { %v2564_v11 = vrot.slane %v2550_v20, %v5871_v29  ;;  %v5204_v0 = vcombine.low %v4210_v46, %v4210_v46  ;;  %v5205_v9 = vcombine.high %v4210_v46, %v4210_v46  ;;  %4329 = vst.msk [vmem:[%s6028_s20 + $0x10] sm:$0xf] %vm1932_vm0, %v5196_v6  ;;  %4330 = vst.msk [vmem:[%s6028_s20 + $0x14] sm:$0xf] %vm1932_vm0, %v5197_v50  ;;  %v3250_v19 = vshrl.u32 %v3188_v44, 16 }
 0x394   : > { %v5220_v37 = vcombine.low %v4216_v3, %v4216_v3  ;;  %v5221_v12 = vcombine.high %v4216_v3, %v4216_v3  ;;  %4345 = vst.msk [vmem:[%s6028_s20 + $0x50] sm:$0xf] %vm1932_vm0, %v5212_v24  ;;  %4346 = vst.msk [vmem:[%s6028_s20 + $0x54] sm:$0xf] %vm1932_vm0, %v5213_v13  ;;  %v2573_v26 = vrot.slane %v2565_v7, %v5871_v29 }
 0x395   : > { %v2580_v32 = vrot.slane %v2566_v34, %v5871_v29  ;;  %v2892_v1 = vrot.slane %v2885_v42, %v5868_v57  ;;  %v2900_v59 = vrot.slane %v5140_v62, %v5868_v57  ;;  %4337 = vst.msk [vmem:[%s6028_s20 + $0x30] sm:$0xf] %vm1932_vm0, %v5204_v0  ;;  %4338 = vst.msk [vmem:[%s6028_s20 + $0x34] sm:$0xf] %vm1932_vm0, %v5205_v9 }
 0x396   : > { %4353 = vst.msk [vmem:[%s6028_s20 + $0x70] sm:$0xf] %vm1932_vm0, %v5220_v37  ;;  %4354 = vst.msk [vmem:[%s6028_s20 + $0x74] sm:$0xf] %vm1932_vm0, %v5221_v12  ;;  %v2908_v54 = vrot.slane %v2901_v18, %v5868_v57  ;;  %v2916_v49 = vrot.slane %v5141_v41, %v5868_v57  ;;  %v2935_v51 = vcombine.low %v2557_v21, %v2564_v11 }
 0x397   : > { %v5142_v4 = vcombine.high %v2557_v21, %v2564_v11  ;;  %v2917_v5 = vcombine.low %v2892_v1, %v2900_v59  ;;  %v2951_v47 = vcombine.low %v2573_v26, %v2580_v32  ;;  %v5143_v14 = vcombine.high %v2573_v26, %v2580_v32 }
 0x398   : > { %v3247_v23 = vpack.i.b16 %v3188_v44, %v6133_v22  ;;  %v2925_v16 = vcombine.low %v2908_v54, %v2916_v49  ;;  %v2942_v36 = vrot.slane %v2935_v51, %v5868_v57  ;;  %v3251_v15 = vpack.i.b16 %v3250_v19, %v3249_v25 }
 0x399   : > { %v2950_v8 = vrot.slane %v5142_v4, %v5868_v57  ;;  %v2924_v45 = vrot.slane %v2917_v5, %v5871_v29  ;;  %v2958_v31 = vrot.slane %v2951_v47, %v5868_v57  ;;  %v2966_v60 = vrot.slane %v5143_v14, %v5868_v57 }
 0x39a   : > { %v3664_v27 = vcombine.high %v3247_v23, %v5865_v53  ;;  %v2932_v63 = vrot.slane %v2925_v16, %v5871_v29  ;;  %v3671_v33 = vrot.slane %v3247_v23, %v5868_v57  ;;  %v3663_v38 = vrot.slane %v3649_v58, %v5868_v57 }
 0x39b   : > { %v2967_v28 = vcombine.low %v2942_v36, %v2950_v8  ;;  %v3722_v40 = vrot.slane %v6161_v10, %v5868_v57  ;;  %v2975_v55 = vcombine.low %v2958_v31, %v2966_v60  ;;  %v3730_v56 = vcombine.high %v3251_v15, %v5865_v53 }
 0x39c   : > { %v3678_v39 = vrot.slane %v3664_v27, %v5868_v57  ;;  %v2933_v35 = vcombine.low %v2924_v45, %v2932_v63  ;;  %v2934_v42 = vcombine.high %v2924_v45, %v2932_v63  ;;  %v3679_v22 = vcombine.low %v6170_v17, %v3671_v33 }
 0x39d   : > { %v2974_v62 = vrot.slane %v2967_v28, %v5871_v29  ;;  %v2982_v25 = vrot.slane %v2975_v55, %v5871_v29  ;;  %v3680_v18 = vcombine.high %v6170_v17, %v3671_v33  ;;  %v3737_v46 = vrot.slane %v3251_v15, %v5868_v57 }
 0x39e   : > { %v3695_v41 = vcombine.low %v3663_v38, %v3678_v39  ;;  %v3696_v61 = vcombine.high %v3663_v38, %v3678_v39  ;;  %v3024_v58 = vshrl.u32 %v2933_v35, 16  ;;  %v3030_v52 = vshrl.u32 %v2934_v42, 16 }
 0x39f   : > { %v2983_v2 = vcombine.low %v2974_v62, %v2982_v25  ;;  %v2984_v43 = vcombine.high %v2974_v62, %v2982_v25  ;;  %v3687_v20 = vrot.slane %v3679_v22, %v5871_v29  ;;  %v3694_v7 = vrot.slane %v3680_v18, %v5871_v29 }
 0x3a0   : > { %v3703_v34 = vrot.slane %v3695_v41, %v5871_v29  ;;  %v3710_v17 = vrot.slane %v3696_v61, %v5871_v29  ;;  %v3744_v3 = vrot.slane %v3730_v56, %v5868_v57  ;;  %v3745_v24 = vcombine.low %v3722_v40, %v3737_v46 }
 0x3a1   : > { %v3023_v10 = vpack.i.b16 %v2983_v2, %v2933_v35  ;;  %v3025_v30 = vshrl.u32 %v2983_v2, 16  ;;  %v3029_v6 = vpack.i.b16 %v2984_v43, %v2934_v42  ;;  %v3031_v50 = vshrl.u32 %v2984_v43, 16 }
 0x3a2   : > { %v3746_v53 = vcombine.high %v3722_v40, %v3737_v46  ;;  %v3761_v13 = vcombine.low %v3729_v48, %v3744_v3  ;;  %v3762_v21 = vcombine.high %v3729_v48, %v3744_v3  ;;  %v3753_v26 = vrot.slane %v3745_v24, %v5871_v29  ;;  %v4401_v24 = vld [vmem:[%s5961_s7 + $0x10] sm:$0xff] (%p5671_p10)  }
 0x3a3   : > { %v3026_v11 = vpack.i.b16 %v3025_v30, %v3024_v58  ;;  %v3032_v0 = vpack.i.b16 %v3031_v50, %v3030_v52  ;;  %v5150_v9 = vcombine.low %v3023_v10, %v3023_v10  ;;  %v5151_v37 = vcombine.high %v3023_v10, %v3023_v10  ;;  %v4397_v50 = vld [vmem:[%s5961_s7 + $0x8] sm:$0xff] (%p5671_p10)   ;;  %4402 = vst [vmem:[%s4376_s24 + $0x10] sm:$0xff] (%p5671_p10), %v4401_v24  }
 0x3a4   : > { %v5166_v12 = vcombine.low %v3029_v6, %v3029_v6  ;;  %v5167_v44 = vcombine.high %v3029_v6, %v3029_v6  ;;  %v3760_v32 = vrot.slane %v3746_v53, %v5871_v29  ;;  %v3769_v51 = vrot.slane %v3761_v13, %v5871_v29  ;;  %v4393_v6 = vld [vmem:[%s5961_s7] sm:$0xff] (%p5671_p10)   ;;  %v4405_v53 = vld [vmem:[%s5961_s7 + $0x18] sm:$0xff] (%p5671_p10)   ;;  %4398 = vst [vmem:[%s4376_s24 + $0x8] sm:$0xff] (%p5671_p10), %v4397_v50  }
 0x3a5   : > { %v5158_v1 = vcombine.low %v3026_v11, %v3026_v11  ;;  %v5159_v59 = vcombine.high %v3026_v11, %v3026_v11  ;;  %v5174_v54 = vcombine.low %v3032_v0, %v3032_v0  ;;  %v5175_v49 = vcombine.high %v3032_v0, %v3032_v0  ;;  %3135 = vst.msk [vmem:[%s6111_s11 + $0x18] sm:$0xf] %vm1932_vm0, %v5150_v9  ;;  %v4409_v13 = vld [vmem:[%s5961_s7 + $0x20] sm:$0xff] (%p5671_p10)   ;;  %v4417_v11 = vld [vmem:[%s5961_s7 + $0x30] sm:$0xff] (%p5671_p10)   ;;  %v4421_v0 = vld [vmem:[%s5961_s7 + $0x38] sm:$0xff] (%p5671_p10)  }
 0x3a6   : > { %3136 = vst.msk [vmem:[%s6111_s11 + $0x1c] sm:$0xf] %vm1932_vm0, %v5151_v37  ;;  %3151 = vst.msk [vmem:[%s6111_s11 + $0x58] sm:$0xf] %vm1932_vm0, %v5166_v12  ;;  %v3776_v4 = vrot.slane %v3762_v21, %v5871_v29  ;;  %v4081_v5 = vcombine.low %v3687_v20, %v3694_v7  ;;  %v5188_v47 = vcombine.high %v3687_v20, %v3694_v7  ;;  %v4413_v21 = vld [vmem:[%s5961_s7 + $0x28] sm:$0xff] (%p5671_p10)   ;;  %v4425_v9 = vld [vmem:[%s5961_s7 + $0x40] sm:$0xff] (%p5671_p10)  }
 0x3a7   : > { %3152 = vst.msk [vmem:[%s6111_s11 + $0x5c] sm:$0xf] %vm1932_vm0, %v5167_v44  ;;  %3143 = vst.msk [vmem:[%s6111_s11 + $0x38] sm:$0xf] %vm1932_vm0, %v5158_v1  ;;  %v4097_v14 = vcombine.low %v3703_v34, %v3710_v17  ;;  %v5189_v23 = vcombine.high %v3703_v34, %v3710_v17  ;;  %v4131_v16 = vcombine.low %v3753_v26, %v3760_v32  ;;  %v4429_v37 = vld [vmem:[%s5961_s7 + $0x48] sm:$0xff] (%p5671_p10)   ;;  %v4433_v12 = vld [vmem:[%s5961_s7 + $0x50] sm:$0xff] (%p5671_p10)  }
 0x3a8   : > { %3144 = vst.msk [vmem:[%s6111_s11 + $0x3c] sm:$0xf] %vm1932_vm0, %v5159_v59  ;;  %3159 = vst.msk [vmem:[%s6111_s11 + $0x78] sm:$0xf] %vm1932_vm0, %v5174_v54  ;;  %v5190_v36 = vcombine.high %v3753_v26, %v3760_v32  ;;  %v4088_v8 = vrot.slane %v4081_v5, %v5868_v57  ;;  %v4096_v19 = vrot.slane %v5188_v47, %v5868_v57  ;;  %v4437_v44 = vld [vmem:[%s5961_s7 + $0x58] sm:$0xff] (%p5671_p10)   ;;  %v4441_v26 = vld [vmem:[%s5961_s7 + $0x60] sm:$0xff] (%p5671_p10)  }
 0x3a9   : > { %3160 = vst.msk [vmem:[%s6111_s11 + $0x7c] sm:$0xf] %vm1932_vm0, %v5175_v49  ;;  %v4147_v45 = vcombine.low %v3769_v51, %v3776_v4  ;;  %v5191_v31 = vcombine.high %v3769_v51, %v3776_v4  ;;  %v4104_v60 = vrot.slane %v4097_v14, %v5868_v57  ;;  %v4112_v27 = vrot.slane %v5189_v23, %v5868_v57  ;;  %v4445_v32 = vld [vmem:[%s5961_s7 + $0x68] sm:$0xff] (%p5671_p10)   ;;  %v4449_v1 = vld [vmem:[%s5961_s7 + $0x70] sm:$0xff] (%p5671_p10)   ;;  %v4453_v59 = vld [vmem:[%s5961_s7 + $0x78] sm:$0xff] (%p5671_p10)  }
 0x3aa   : > { %v4138_v63 = vrot.slane %v4131_v16, %v5868_v57  ;;  %v4146_v28 = vrot.slane %v5190_v36, %v5868_v57  ;;  %v4113_v15 = vcombine.low %v4088_v8, %v4096_v19  ;;  %4394 = vst [vmem:[%s4376_s24] sm:$0xff] (%p5671_p10), %v4393_v6   ;;  %4406 = vst [vmem:[%s4376_s24 + $0x18] sm:$0xff] (%p5671_p10), %v4405_v53  }
 0x3ab   : > { %v4154_v33 = vrot.slane %v4147_v45, %v5868_v57  ;;  %v4162_v38 = vrot.slane %v5191_v31, %v5868_v57  ;;  %v4121_v40 = vcombine.low %v4104_v60, %v4112_v27  ;;  %4410 = vst [vmem:[%s4376_s24 + $0x40] sm:$0xff] (%p5671_p10), %v4409_v13   ;;  %4414 = vst [vmem:[%s4376_s24 + $0x48] sm:$0xff] (%p5671_p10), %v4413_v21  }
 0x3ac   : > { %v4163_v55 = vcombine.low %v4138_v63, %v4146_v28  ;;  %v4120_v35 = vrot.slane %v4113_v15, %v5871_v29  ;;  %4418 = vst [vmem:[%s4376_s24 + $0x50] sm:$0xff] (%p5671_p10), %v4417_v11   ;;  %4422 = vst [vmem:[%s4376_s24 + $0x58] sm:$0xff] (%p5671_p10), %v4421_v0  }
 0x3ad   : > { %v4171_v39 = vcombine.low %v4154_v33, %v4162_v38  ;;  %v4128_v42 = vrot.slane %v4121_v40, %v5871_v29  ;;  %4426 = vst [vmem:[%s4376_s24 + $0x80] sm:$0xff] (%p5671_p10), %v4425_v9   ;;  %4430 = vst [vmem:[%s4376_s24 + $0x88] sm:$0xff] (%p5671_p10), %v4429_v37  }
 0x3ae   : > { %v4170_v62 = vrot.slane %v4163_v55, %v5871_v29  ;;  %4434 = vst [vmem:[%s4376_s24 + $0x90] sm:$0xff] (%p5671_p10), %v4433_v12   ;;  %4438 = vst [vmem:[%s4376_s24 + $0x98] sm:$0xff] (%p5671_p10), %v4437_v44  }
 0x3af   : > { %v4178_v22 = vrot.slane %v4171_v39, %v5871_v29  ;;  %v4129_v25 = vcombine.low %v4120_v35, %v4128_v42  ;;  %v4130_v18 = vcombine.high %v4120_v35, %v4128_v42  ;;  %4442 = vst [vmem:[%s4376_s24 + $0xc0] sm:$0xff] (%p5671_p10), %v4441_v26   ;;  %4446 = vst [vmem:[%s4376_s24 + $0xc8] sm:$0xff] (%p5671_p10), %v4445_v32  }
 0x3b0   : > { %4450 = vst [vmem:[%s4376_s24 + $0xd0] sm:$0xff] (%p5671_p10), %v4449_v1   ;;  %4454 = vst [vmem:[%s4376_s24 + $0xd8] sm:$0xff] (%p5671_p10), %v4453_v59  }
 0x3b1   : > { %v4179_v41 = vcombine.low %v4170_v62, %v4178_v22  ;;  %v4180_v61 = vcombine.high %v4170_v62, %v4178_v22  ;;  %v4220_v48 = vshrl.u32 %v4129_v25, 16  ;;  %v4226_v58 = vshrl.u32 %v4130_v18, 16 }
 0x3b3   : > { %v4219_v57 = vpack.i.b16 %v4179_v41, %v4129_v25  ;;  %v4221_v52 = vshrl.u32 %v4179_v41, 16  ;;  %v4225_v56 = vpack.i.b16 %v4180_v61, %v4130_v18  ;;  %v4227_v2 = vshrl.u32 %v4180_v61, 16 }
 0x3b5   : > { %v4222_v43 = vpack.i.b16 %v4221_v52, %v4220_v48  ;;  %v4228_v20 = vpack.i.b16 %v4227_v2, %v4226_v58  ;;  %v5198_v29 = vcombine.low %v4219_v57, %v4219_v57  ;;  %v5199_v7 = vcombine.high %v4219_v57, %v4219_v57 }
 0x3b6   : > { %v5214_v34 = vcombine.low %v4225_v56, %v4225_v56  ;;  %v5215_v17 = vcombine.high %v4225_v56, %v4225_v56 }
 0x3b7   : > { %v5206_v46 = vcombine.low %v4222_v43, %v4222_v43  ;;  %v5207_v3 = vcombine.high %v4222_v43, %v4222_v43  ;;  %v5222_v10 = vcombine.low %v4228_v20, %v4228_v20  ;;  %v5223_v30 = vcombine.high %v4228_v20, %v4228_v20  ;;  %4331 = vst.msk [vmem:[%s6028_s20 + $0x18] sm:$0xf] %vm1932_vm0, %v5198_v29  ;;  %4371 = sbr.rel (!%p5671_p10) target bundleno = 956 (0x3bc), region = 48 }
 0x3b8   : > { %4332 = vst.msk [vmem:[%s6028_s20 + $0x1c] sm:$0xf] %vm1932_vm0, %v5199_v7  ;;  %4347 = vst.msk [vmem:[%s6028_s20 + $0x58] sm:$0xf] %vm1932_vm0, %v5214_v34 }
 0x3b9   : > { %4348 = vst.msk [vmem:[%s6028_s20 + $0x5c] sm:$0xf] %vm1932_vm0, %v5215_v17  ;;  %4339 = vst.msk [vmem:[%s6028_s20 + $0x38] sm:$0xf] %vm1932_vm0, %v5206_v46 }
 0x3ba   : > { %4340 = vst.msk [vmem:[%s6028_s20 + $0x3c] sm:$0xf] %vm1932_vm0, %v5207_v3  ;;  %4355 = vst.msk [vmem:[%s6028_s20 + $0x78] sm:$0xf] %vm1932_vm0, %v5222_v10 }
 0x3bb   : > { %4356 = vst.msk [vmem:[%s6028_s20 + $0x7c] sm:$0xf] %vm1932_vm0, %v5223_v30 }
 0x3bc PF: > { %4544 = sbr.rel (!%p5671_p10) target bundleno = 975 (0x3cf), region = 89  ;;  %s6857_s25 = sld [smem:[#allocation11_spill]] (%p5671_p10)  ;;  %v4566_v54 = vld [vmem:[%s6111_s11] sm:$0xff] (%p5671_p10)   ;;  %v4570_v49 = vld [vmem:[%s6111_s11 + $0x8] sm:$0xff] (%p5671_p10)   ;;  %v4574_v51 = vld [vmem:[%s6111_s11 + $0x10] sm:$0xff] (%p5671_p10)  }
 0x3bd   : > { %s6858_s30 = sld [smem:[#allocation12_spill]] (%p5671_p10)  ;;  %v4578_v4 = vld [vmem:[%s6111_s11 + $0x18] sm:$0xff] (%p5671_p10)   ;;  %v4582_v5 = vld [vmem:[%s6111_s11 + $0x20] sm:$0xff] (%p5671_p10)   ;;  %v4586_v47 = vld [vmem:[%s6111_s11 + $0x28] sm:$0xff] (%p5671_p10)  }
 0x3be   : > { %v4590_v14 = vld [vmem:[%s6111_s11 + $0x30] sm:$0xff] (%p5671_p10)   ;;  %v4594_v23 = vld [vmem:[%s6111_s11 + $0x38] sm:$0xff] (%p5671_p10)   ;;  %v4598_v16 = vld [vmem:[%s6111_s11 + $0x40] sm:$0xff] (%p5671_p10)   ;;  %s6859_s3 = sld [smem:[#allocation16_spill]] (%p5671_p10) }
 0x3bf   : > { %v4602_v36 = vld [vmem:[%s6111_s11 + $0x48] sm:$0xff] (%p5671_p10)   ;;  %v4606_v8 = vld [vmem:[%s6111_s11 + $0x50] sm:$0xff] (%p5671_p10)   ;;  %v4610_v19 = vld [vmem:[%s6111_s11 + $0x58] sm:$0xff] (%p5671_p10)  }
 0x3c0   : > { %v4614_v45 = vld [vmem:[%s6111_s11 + $0x60] sm:$0xff] (%p5671_p10)   ;;  %v4618_v31 = vld [vmem:[%s6111_s11 + $0x68] sm:$0xff] (%p5671_p10)   ;;  %v4622_v60 = vld [vmem:[%s6111_s11 + $0x70] sm:$0xff] (%p5671_p10)  }
 0x3c1   : > { %v4626_v27 = vld [vmem:[%s6111_s11 + $0x78] sm:$0xff]  }
 0x3c2   : > { %s5230_s8 = sshll.u32 %s6857_s25, 3 }
 0x3c3   : > { %s5231_s9 = sshll.u32 %s6858_s30, 6 }
 0x3c4   : > { %s4547_s14 = sadd.s32 %s5231_s9, %s5230_s8 }
 0x3c5   : > { %s5232_s15 = sshll.u32 %s4547_s14, 2 }
 0x3c6   : > { %s4549_s19 = scalar_lea.vmem %s6859_s3, %s5232_s15 }
 0x3c7   : > { %4567 = vst [vmem:[%s4549_s19] sm:$0xff] %v4566_v54   ;;  %4571 = vst [vmem:[%s4549_s19 + $0x8] sm:$0xff] %v4570_v49  }
 0x3c8   : > { %4575 = vst [vmem:[%s4549_s19 + $0x10] sm:$0xff] %v4574_v51   ;;  %4579 = vst [vmem:[%s4549_s19 + $0x18] sm:$0xff] %v4578_v4  }
 0x3c9   : > { %4583 = vst [vmem:[%s4549_s19 + $0x40] sm:$0xff] %v4582_v5   ;;  %4587 = vst [vmem:[%s4549_s19 + $0x48] sm:$0xff] %v4586_v47  }
 0x3ca   : > { %4591 = vst [vmem:[%s4549_s19 + $0x50] sm:$0xff] %v4590_v14   ;;  %4595 = vst [vmem:[%s4549_s19 + $0x58] sm:$0xff] %v4594_v23  }
 0x3cb   : > { %4599 = vst [vmem:[%s4549_s19 + $0x80] sm:$0xff] %v4598_v16   ;;  %4603 = vst [vmem:[%s4549_s19 + $0x88] sm:$0xff] %v4602_v36  }
 0x3cc   : > { %4607 = vst [vmem:[%s4549_s19 + $0x90] sm:$0xff] %v4606_v8   ;;  %4611 = vst [vmem:[%s4549_s19 + $0x98] sm:$0xff] %v4610_v19  }
 0x3cd   : > { %4615 = vst [vmem:[%s4549_s19 + $0xc0] sm:$0xff] %v4614_v45   ;;  %4619 = vst [vmem:[%s4549_s19 + $0xc8] sm:$0xff] %v4618_v31  }
 0x3ce   : > { %4623 = vst [vmem:[%s4549_s19 + $0xd0] sm:$0xff] %v4622_v60   ;;  %4627 = vst [vmem:[%s4549_s19 + $0xd8] sm:$0xff] %v4626_v27  }
 0x3cf PF: > { %4717 = sbr.rel (!%p5671_p10) target bundleno = 994 (0x3e2), region = 130  ;;  %s6860_s12 = sld [smem:[#allocation11_spill]] (%p5671_p10)  ;;  %v4739_v63 = vld [vmem:[%s6028_s20] sm:$0xff] (%p5671_p10)   ;;  %v4743_v28 = vld [vmem:[%s6028_s20 + $0x8] sm:$0xff] (%p5671_p10)   ;;  %v4747_v15 = vld [vmem:[%s6028_s20 + $0x10] sm:$0xff] (%p5671_p10)  }
 0x3d0   : > { %s6861_s4 = sld [smem:[#allocation12_spill]] (%p5671_p10)  ;;  %v4751_v33 = vld [vmem:[%s6028_s20 + $0x18] sm:$0xff] (%p5671_p10)   ;;  %v4755_v38 = vld [vmem:[%s6028_s20 + $0x20] sm:$0xff] (%p5671_p10)   ;;  %v4759_v40 = vld [vmem:[%s6028_s20 + $0x28] sm:$0xff] (%p5671_p10)  }
 0x3d1   : > { %v4763_v55 = vld [vmem:[%s6028_s20 + $0x30] sm:$0xff] (%p5671_p10)   ;;  %v4767_v39 = vld [vmem:[%s6028_s20 + $0x38] sm:$0xff] (%p5671_p10)   ;;  %v4771_v35 = vld [vmem:[%s6028_s20 + $0x40] sm:$0xff] (%p5671_p10)   ;;  %s6862_s13 = sld [smem:[#allocation17_spill]] (%p5671_p10) }
 0x3d2   : > { %v4775_v42 = vld [vmem:[%s6028_s20 + $0x48] sm:$0xff] (%p5671_p10)   ;;  %v4779_v62 = vld [vmem:[%s6028_s20 + $0x50] sm:$0xff] (%p5671_p10)   ;;  %v4783_v22 = vld [vmem:[%s6028_s20 + $0x58] sm:$0xff] (%p5671_p10)  }
 0x3d3   : > { %v4787_v25 = vld [vmem:[%s6028_s20 + $0x60] sm:$0xff] (%p5671_p10)   ;;  %v4791_v18 = vld [vmem:[%s6028_s20 + $0x68] sm:$0xff] (%p5671_p10)   ;;  %v4795_v41 = vld [vmem:[%s6028_s20 + $0x70] sm:$0xff] (%p5671_p10)  }
 0x3d4   : > { %v4799_v61 = vld [vmem:[%s6028_s20 + $0x78] sm:$0xff]  }
 0x3d5   : > { %s5233_s5 = sshll.u32 %s6860_s12, 3 }
 0x3d6   : > { %s5234_s11 = sshll.u32 %s6861_s4, 6 }
 0x3d7   : > { %s4720_s29 = sadd.s32 %s5234_s11, %s5233_s5 }
 0x3d8   : > { %s5235_s6 = sshll.u32 %s4720_s29, 2 }
 0x3d9   : > { %s4722_s24 = scalar_lea.vmem %s6862_s13, %s5235_s6 }
 0x3da   : > { %4740 = vst [vmem:[%s4722_s24] sm:$0xff] %v4739_v63   ;;  %4744 = vst [vmem:[%s4722_s24 + $0x8] sm:$0xff] %v4743_v28  }
 0x3db   : > { %4748 = vst [vmem:[%s4722_s24 + $0x10] sm:$0xff] %v4747_v15   ;;  %4752 = vst [vmem:[%s4722_s24 + $0x18] sm:$0xff] %v4751_v33  }
 0x3dc   : > { %4756 = vst [vmem:[%s4722_s24 + $0x40] sm:$0xff] %v4755_v38   ;;  %4760 = vst [vmem:[%s4722_s24 + $0x48] sm:$0xff] %v4759_v40  }
 0x3dd   : > { %4764 = vst [vmem:[%s4722_s24 + $0x50] sm:$0xff] %v4763_v55   ;;  %4768 = vst [vmem:[%s4722_s24 + $0x58] sm:$0xff] %v4767_v39  }
 0x3de   : > { %4772 = vst [vmem:[%s4722_s24 + $0x80] sm:$0xff] %v4771_v35   ;;  %4776 = vst [vmem:[%s4722_s24 + $0x88] sm:$0xff] %v4775_v42  }
 0x3df   : > { %4780 = vst [vmem:[%s4722_s24 + $0x90] sm:$0xff] %v4779_v62   ;;  %4784 = vst [vmem:[%s4722_s24 + $0x98] sm:$0xff] %v4783_v22  }
 0x3e0   : > { %4788 = vst [vmem:[%s4722_s24 + $0xc0] sm:$0xff] %v4787_v25   ;;  %4792 = vst [vmem:[%s4722_s24 + $0xc8] sm:$0xff] %v4791_v18  }
 0x3e1   : > { %4796 = vst [vmem:[%s4722_s24 + $0xd0] sm:$0xff] %v4795_v41   ;;  %4800 = vst [vmem:[%s4722_s24 + $0xd8] sm:$0xff] %v4799_v61  }
 0x3e2 PF: > { %s21_s28 = sadd.s32 1, %s5538_s28   ;;  %s6863_s30 = sld [smem:[#allocation13_spill]] }
 0x3e3   : > { %p18_p1 = scmp.ge.s32.totalorder %s21_s28, 6   ;;  %s6864_s21 = smov %s5514_s22 }
 0x3e4   : > { %s6865_s22 = smov %s5518_s23  ;;  %s6866_s23 = smov %s5684_s17 }
 0x3e5   : > { %s6867_s24 = smov %s5530_s26  ;;  %s6868_s25 = smov %s5534_s27 }
 0x3e6   : > { %s6870_s27 = smov %s6876_s18  ;;  %20 = sbr.rel (!%p18_p1) target bundleno = 11 (0xb), region = 227 }
 0x3e8   : > { %s6869_s26 = smov %s6863_s30 }
 0x3eb   :  { %4914 = vsyncpa [#allocation3], 1 }
 0x3ec   :  { %4916 = vsyncpa [#allocation3 + $0x1], 1 }
 0x3ed   :  { %4917 = vsyncpa [#allocation5], 1 }

</bundles_post_ra>
